<compile_context>
chip_gen: v5e
topology: v5e:2x2
jax: 0.10.0
libtpu: 0.0.40
codegen_flags: <defaults>
</compile_context>

<pallas_src>
import functools

import jax
import jax.numpy as jnp
from jax.experimental import pallas as pl
from jax.experimental.pallas import tpu as pltpu


# --------------------------------------------------------------------------
# Small helpers.
# --------------------------------------------------------------------------

def _round_up(x, m):
    return ((x + m - 1) // m) * m


def _largest_divisor_leq(n, cap):
    for d in range(min(cap, n), 0, -1):
        if n % d == 0:
            return d
    return 1


def _pick_tile(n, candidates):
    for c in candidates:
        if n % c == 0:
            return c
    return n


def _pick_batch_tile(batch, max_tile_b=128):
    """Pick (tile_b, pad_b) minimizing padding (avoids full jnp.pad copies)."""
    b8 = _round_up(batch, 8)
    if b8 <= max_tile_b:
        return b8, b8
    best = None  # (tile_b, pad_b, waste)
    for tb in range(max_tile_b, 7, -8):
        pb = _round_up(batch, tb)
        waste = pb - batch
        if best is None or waste < best[2] or (waste == best[2] and tb > best[0]):
            best = (tb, pb, waste)
    return best[0], best[1]


_FUSED_VMEM_BUDGET = 12 * 1024 * 1024   # conservative: below v5e's 16 MiB scoped default


def _fused_vmem_bytes(tt, tile_b, n_in, n_hid, mxu_bytes):
    x_bufs = 2 * tt * tile_b * n_in * mxu_bytes        # x time-block (double-buffered)
    w_bufs = 2 * n_in * n_hid * mxu_bytes              # resident W^T
    bias = 2 * n_hid * 4
    init = 2 * 2 * tile_b * n_hid * 4                  # inner0 / outer0
    seq_out = 2 * 2 * tt * tile_b * n_hid * 4          # delayed inner / outer blocks
    fin_out = 2 * 2 * tile_b * n_hid * 4               # final state blocks
    scratch = 2 * tile_b * n_hid * 4                   # carried inner / outer
    return x_bufs + w_bufs + bias + init + seq_out + fin_out + scratch


# --------------------------------------------------------------------------
# 1) FUSED kernel: projection + spiking recurrence, state carried in VMEM,
#    delayed sequences and final state emitted directly.
# --------------------------------------------------------------------------

def _fused_snn_kernel(x_ref, w_ref, b_ref, inner0_ref, outer0_ref,
                      d_inner_ref, d_outer_ref, fin_inner_ref, fin_outer_ref,
                      inner_sc, outer_sc, *, decay, threshold, penalty_scale, tt):
    t_blk = pl.program_id(1)

    @pl.when(t_blk == 0)
    def _():
        inner_sc[...] = inner0_ref[...]
        outer_sc[...] = outer0_ref[...]

    # Short static loop over the TT sub-steps of this time block.
    for s in range(tt):
        # Delayed return of the PyTorch module: state BEFORE consuming x_t.
        d_inner_ref[s] = inner_sc[...]
        d_outer_ref[s] = outer_sc[...]

        z = jnp.dot(x_ref[s], w_ref[...],
                    preferred_element_type=jnp.float32) + b_ref[...]
        inner = z + inner_sc[...] * decay
        outer = jnp.maximum(inner - threshold, 0.0)
        # gate == (outer > 0) == (inner > threshold); fused select, PyTorch-exact
        # arithmetic inside the taken branch.
        inner_sc[...] = jnp.where(inner > threshold,
                                  inner - penalty_scale * inner,
                                  inner)
        outer_sc[...] = outer

    @pl.when(t_blk == pl.num_programs(1) - 1)
    def _():
        fin_inner_ref[...] = inner_sc[...]
        fin_outer_ref[...] = outer_sc[...]


def fused_snn_pallas(x_seq, w_t, b, inner0, outer0, *, decay, threshold,
                     penalty_threshold, tt, tile_b, mxu_dtype=None):
    T, pad_b, n_in = x_seq.shape
    n_hid = w_t.shape[1]

    if mxu_dtype is not None:
        x_seq = x_seq.astype(mxu_dtype)
        w_t = w_t.astype(mxu_dtype)

    kernel = functools.partial(
        _fused_snn_kernel, decay=decay, threshold=threshold,
        penalty_scale=penalty_threshold / threshold, tt=tt)

    grid = (pad_b // tile_b, T // tt)
    out_shape = (
        jax.ShapeDtypeStruct((T, pad_b, n_hid), jnp.float32),   # delayed inner seq
        jax.ShapeDtypeStruct((T, pad_b, n_hid), jnp.float32),   # delayed outer seq
        jax.ShapeDtypeStruct((pad_b, n_hid), jnp.float32),      # final inner
        jax.ShapeDtypeStruct((pad_b, n_hid), jnp.float32),      # final outer
    )
    return pl.pallas_call(
        kernel,
        out_shape=out_shape,
        grid_spec=pltpu.PrefetchScalarGridSpec(
            num_scalar_prefetch=0,
            grid=grid,
            in_specs=[
                pl.BlockSpec((tt, tile_b, n_in), lambda i, t: (t, i, 0)),  # x block
                pl.BlockSpec((n_in, n_hid), lambda i, t: (0, 0)),          # W^T resident
                pl.BlockSpec((1, n_hid), lambda i, t: (0, 0)),             # bias resident
                pl.BlockSpec((tile_b, n_hid), lambda i, t: (i, 0)),        # init inner
                pl.BlockSpec((tile_b, n_hid), lambda i, t: (i, 0)),        # init outer
            ],
            out_specs=[
                pl.BlockSpec((tt, tile_b, n_hid), lambda i, t: (t, i, 0)),
                pl.BlockSpec((tt, tile_b, n_hid), lambda i, t: (t, i, 0)),
                pl.BlockSpec((tile_b, n_hid), lambda i, t: (i, 0)),
                pl.BlockSpec((tile_b, n_hid), lambda i, t: (i, 0)),
            ],
            scratch_shapes=[pltpu.VMEM((tile_b, n_hid), jnp.float32),
                            pltpu.VMEM((tile_b, n_hid), jnp.float32)],
        ),
        compiler_params=pltpu.CompilerParams(
            dimension_semantics=("parallel", "arbitrary")),
    )(x_seq, w_t, b, inner0, outer0)


# --------------------------------------------------------------------------
# 2) Two-pass fallback for large n_inputs:
#    (a) K-tiled MXU GEMM with f32 accumulator scratch.
# --------------------------------------------------------------------------

def _linear_kernel(x_ref, w_ref, b_ref, z_ref, acc_ref):
    k = pl.program_id(2)

    @pl.when(k == 0)
    def _():
        acc_ref[...] = jnp.zeros_like(acc_ref)

    acc_ref[...] += jnp.dot(x_ref[...], w_ref[...],
                            preferred_element_type=jnp.float32)

    @pl.when(k == pl.num_programs(2) - 1)
    def _():
        z_ref[...] = (acc_ref[...] + b_ref[...]).astype(z_ref.dtype)


def linear_pallas(x, w_t, b, *, mxu_dtype=None):
    """z = x @ w_t + b for x of shape (M, n_in); K-tiled, VMEM-bounded."""
    M, n_in = x.shape
    n_hid = w_t.shape[1]

    if mxu_dtype is not None:
        x = x.astype(mxu_dtype)
        w_t = w_t.astype(mxu_dtype)

    tile_m = _pick_tile(M, (256, 128, 64, 32, 16, 8))
    tile_n = n_hid if n_hid <= 512 else _pick_tile(n_hid, (512, 256, 128))
    tile_k = n_in if n_in <= 512 else _pick_tile(n_in, (512, 256, 128))

    grid = (M // tile_m, n_hid // tile_n, n_in // tile_k)
    return pl.pallas_call(
        _linear_kernel,
        out_shape=jax.ShapeDtypeStruct((M, n_hid), jnp.float32),
        grid_spec=pltpu.PrefetchScalarGridSpec(
            num_scalar_prefetch=0,
            grid=grid,
            in_specs=[
                pl.BlockSpec((tile_m, tile_k), lambda i, j, k: (i, k)),
                pl.BlockSpec((tile_k, tile_n), lambda i, j, k: (k, j)),
                pl.BlockSpec((1, tile_n), lambda i, j, k: (0, j)),
            ],
            out_specs=pl.BlockSpec((tile_m, tile_n), lambda i, j, k: (i, j)),
            scratch_shapes=[pltpu.VMEM((tile_m, tile_n), jnp.float32)],
        ),
        compiler_params=pltpu.CompilerParams(
            dimension_semantics=("parallel", "parallel", "arbitrary")),
    )(x, w_t, b)


# --------------------------------------------------------------------------
#    (b) Recurrence over precomputed z — same delayed-output / time-blocked
#        structure as the fused kernel, minus the matmul.
# --------------------------------------------------------------------------

def _snn_recurrence_kernel(z_ref, inner0_ref, outer0_ref,
                           d_inner_ref, d_outer_ref, fin_inner_ref, fin_outer_ref,
                           inner_sc, outer_sc, *, decay, threshold, penalty_scale, tt):
    t_blk = pl.program_id(1)

    @pl.when(t_blk == 0)
    def _():
        inner_sc[...] = inner0_ref[...]
        outer_sc[...] = outer0_ref[...]

    for s in range(tt):
        d_inner_ref[s] = inner_sc[...]
        d_outer_ref[s] = outer_sc[...]
        inner = z_ref[s] + inner_sc[...] * decay
        outer = jnp.maximum(inner - threshold, 0.0)
        inner_sc[...] = jnp.where(inner > threshold,
                                  inner - penalty_scale * inner,
                                  inner)
        outer_sc[...] = outer

    @pl.when(t_blk == pl.num_programs(1) - 1)
    def _():
        fin_inner_ref[...] = inner_sc[...]
        fin_outer_ref[...] = outer_sc[...]


def snn_recurrence_pallas(z_seq, inner0, outer0, *, decay, threshold,
                          penalty_threshold, tt, tile_b):
    T, pad_b, n_hid = z_seq.shape
    kernel = functools.partial(
        _snn_recurrence_kernel, decay=decay, threshold=threshold,
        penalty_scale=penalty_threshold / threshold, tt=tt)

    grid = (pad_b // tile_b, T // tt)
    out_shape = (
        jax.ShapeDtypeStruct((T, pad_b, n_hid), jnp.float32),
        jax.ShapeDtypeStruct((T, pad_b, n_hid), jnp.float32),
        jax.ShapeDtypeStruct((pad_b, n_hid), jnp.float32),
        jax.ShapeDtypeStruct((pad_b, n_hid), jnp.float32),
    )
    return pl.pallas_call(
        kernel,
        out_shape=out_shape,
        grid_spec=pltpu.PrefetchScalarGridSpec(
            num_scalar_prefetch=0,
            grid=grid,
            in_specs=[
                pl.BlockSpec((tt, tile_b, n_hid), lambda i, t: (t, i, 0)),
                pl.BlockSpec((tile_b, n_hid), lambda i, t: (i, 0)),
                pl.BlockSpec((tile_b, n_hid), lambda i, t: (i, 0)),
            ],
            out_specs=[
                pl.BlockSpec((tt, tile_b, n_hid), lambda i, t: (t, i, 0)),
                pl.BlockSpec((tt, tile_b, n_hid), lambda i, t: (t, i, 0)),
                pl.BlockSpec((tile_b, n_hid), lambda i, t: (i, 0)),
                pl.BlockSpec((tile_b, n_hid), lambda i, t: (i, 0)),
            ],
            scratch_shapes=[pltpu.VMEM((tile_b, n_hid), jnp.float32),
                            pltpu.VMEM((tile_b, n_hid), jnp.float32)],
        ),
        compiler_params=pltpu.CompilerParams(
            dimension_semantics=("parallel", "arbitrary")),
    )(z_seq, inner0, outer0)


# --------------------------------------------------------------------------
# 3) Module-equivalent wrappers.
# --------------------------------------------------------------------------

def spiking_neuron_forward_sequence(x_seq, state, params, *,
                                    decay=0.9, threshold=2.0,
                                    penalty_threshold=2.5, mxu_dtype=None,
                                    max_tile_b=128, max_time_block=8,
                                    force_two_pass=False):
    """Runs SpikingNeuronLayerRNN.forward over a whole sequence.

    x_seq: (T, B, n_inputs).
    Returns ((delayed_inner_seq, delayed_outer_seq), (new_inner, new_outer));
    delayed_*_seq[t] equals exactly what module.forward(x_seq[t]) returns at
    step t (the *previous* state), matching the PyTorch module semantics.
    """
    w_t, b = params
    T, B, n_in = x_seq.shape
    n_hid = w_t.shape[1]
    n_hid_pad = _round_up(n_hid, 128)

    # Pad parameters once so every output block is lane-dense (x128).
    if n_hid_pad != n_hid:
        w_t = jnp.pad(w_t, ((0, 0), (0, n_hid_pad - n_hid)))
        b = jnp.pad(b, ((0, 0), (0, n_hid_pad - n_hid)))

    prev_inner, prev_outer = state
    if prev_inner.ndim == 1:            # reset_state() -> (n_hidden,) broadcast to batch
        prev_inner = jnp.broadcast_to(prev_inner, (B, n_hid))
        prev_outer = jnp.broadcast_to(prev_outer, (B, n_hid))

    # Batch tiling with minimal padding; time blocking to amortize grid overhead.
    tile_b, pad_b = _pick_batch_tile(B, max_tile_b)
    if pad_b // tile_b == 1 and tile_b >= 32 and tile_b % 16 == 0:
        tile_b //= 2                    # give v7x's 2nd TensorCore work
    tt = _largest_divisor_leq(T, max_time_block)

    def _pad_state(s):
        if pad_b != B or n_hid_pad != n_hid:
            return jnp.pad(s.astype(jnp.float32),
                           ((0, pad_b - B), (0, n_hid_pad - n_hid)))
        return s.astype(jnp.float32)

    inner0 = _pad_state(prev_inner)
    outer0 = _pad_state(prev_outer)
    if pad_b != B:
        x_seq = jnp.pad(x_seq, ((0, 0), (0, pad_b - B), (0, 0)))

    mxu_bytes = jnp.dtype(mxu_dtype).itemsize if mxu_dtype is not None else 4
    fuse_ok = (not force_two_pass) and (
        _fused_vmem_bytes(tt, tile_b, n_in, n_hid_pad, mxu_bytes)
        <= _FUSED_VMEM_BUDGET)

    if fuse_ok:
        d_inner, d_outer, fin_inner, fin_outer = fused_snn_pallas(
            x_seq, w_t, b, inner0, outer0,
            decay=decay, threshold=threshold, penalty_threshold=penalty_threshold,
            tt=tt, tile_b=tile_b, mxu_dtype=mxu_dtype)
    else:
        # Large n_inputs: hoisted K-tiled GEMM, then the recurrence over z.
        z = linear_pallas(x_seq.reshape(T * pad_b, n_in), w_t, b,
                          mxu_dtype=mxu_dtype)
        z = z.reshape(T, pad_b, n_hid_pad)
        d_inner, d_outer, fin_inner, fin_outer = snn_recurrence_pallas(
            z, inner0, outer0,
            decay=decay, threshold=threshold, penalty_threshold=penalty_threshold,
            tt=tt, tile_b=tile_b)

    if pad_b != B or n_hid_pad != n_hid:
        d_inner = d_inner[:, :B, :n_hid]
        d_outer = d_outer[:, :B, :n_hid]
        fin_inner = fin_inner[:B, :n_hid]
        fin_outer = fin_outer[:B, :n_hid]
    return (d_inner, d_outer), (fin_inner, fin_outer)


def spiking_neuron_forward(x, state, params, *,
                           decay=0.9, threshold=2.0, penalty_threshold=2.5,
                           mxu_dtype=None):
    """Single-timestep drop-in for SpikingNeuronLayerRNN.forward."""
    (d_inner, d_outer), new_state = spiking_neuron_forward_sequence(
        x[None], state, params, decay=decay, threshold=threshold,
        penalty_threshold=penalty_threshold, mxu_dtype=mxu_dtype)
    return (d_inner[0], d_outer[0]), new_state


# --------------------------------------------------------------------------
# Demo + correctness check (small shapes; exercises padding, fused and
# two-pass paths, and the single-step wrapper).
# --------------------------------------------------------------------------

if __name__ == "__main__":
    T, B, N_IN, N_HID = 8, 6, 196, 100            # small 14x14 inputs, 100 hidden
    DECAY, THRESH, PEN = 0.9, 2.0, 2.5

    key = jax.random.PRNGKey(0)
    k_w, k_b, k_x = jax.random.split(key, 3)

    # Deterministic Xavier-uniform Linear weight (torch layout (out, in)).
    limit = (6.0 / (N_IN + N_HID)) ** 0.5
    w = jax.random.uniform(k_w, (N_HID, N_IN), jnp.float32, -limit, limit)
    w_t = jnp.transpose(w)                         # (N_IN, N_HID) for the kernels
    b_limit = 1.0 / (N_IN ** 0.5)
    b = jax.random.uniform(k_b, (1, N_HID), jnp.float32, -b_limit, b_limit)
    params = (w_t, b)

    # reset_state(): zeros of shape (n_hidden,), broadcast to batch on first call.
    state = (jnp.zeros((N_HID,), jnp.float32), jnp.zeros((N_HID,), jnp.float32))

    x_seq = jax.random.normal(k_x, (T, B, N_IN), jnp.float32)

    # Plain-JAX reference (PyTorch formula, step-by-step loop).
    def ref_step(x, prev_inner):
        z = x @ w_t + b
        inner = z + prev_inner * DECAY
        outer = jnp.maximum(inner - THRESH, 0.0)
        gate = (outer > 0).astype(jnp.float32)
        inner = inner - PEN / THRESH * inner * gate
        return inner, outer

    prev_i = jnp.zeros((B, N_HID), jnp.float32)
    prev_o = jnp.zeros((B, N_HID), jnp.float32)
    ref_d_inner, ref_d_outer = [], []
    for t in range(T):
        ref_d_inner.append(prev_i)
        ref_d_outer.append(prev_o)
        prev_i, prev_o = ref_step(x_seq[t], prev_i)
    ref_d_inner = jnp.stack(ref_d_inner)
    ref_d_outer = jnp.stack(ref_d_outer)

    tol = dict(atol=1e-4, rtol=1e-4)

    # --- fused path (default) ---
    (d_inner, d_outer), (new_i, new_o) = spiking_neuron_forward_sequence(
        x_seq, state, params, decay=DECAY, threshold=THRESH, penalty_threshold=PEN)
    jax.block_until_ready((d_inner, d_outer, new_i, new_o))
    assert jnp.allclose(d_inner, ref_d_inner, **tol)
    assert jnp.allclose(d_outer, ref_d_outer, **tol)
    assert jnp.allclose(new_i, prev_i, **tol)
    assert jnp.allclose(new_o, prev_o, **tol)

    # --- two-pass path (hoisted K-tiled GEMM + recurrence) ---
    (d_inner2, d_outer2), (new_i2, new_o2) = spiking_neuron_forward_sequence(
        x_seq, state, params, decay=DECAY, threshold=THRESH, penalty_threshold=PEN,
        force_two_pass=True)
    jax.block_until_ready((d_inner2, d_outer2, new_i2, new_o2))
    assert jnp.allclose(d_inner2, ref_d_inner, **tol)
    assert jnp.allclose(d_outer2, ref_d_outer, **tol)
    assert jnp.allclose(new_i2, prev_i, **tol)
    assert jnp.allclose(new_o2, prev_o, **tol)

    # --- single-step wrapper (module.forward drop-in) ---
    (s_inner, s_outer), (s_new_i, s_new_o) = spiking_neuron_forward(
        x_seq[0], state, params, decay=DECAY, threshold=THRESH, penalty_threshold=PEN)
    jax.block_until_ready((s_inner, s_outer, s_new_i, s_new_o))
    assert jnp.allclose(s_inner, ref_d_inner[0], **tol)
    assert jnp.allclose(s_outer, ref_d_outer[0], **tol)
    assert jnp.allclose(s_new_i, ref_step(x_seq[0], jnp.zeros((B, N_HID)))[0], **tol)

    print("KERNEL_OK")
</pallas_src>

<mosaic_0001>
module attributes {stable_mosaic.version = 11 : i64} {
  func.func @_fused_snn_kernel(%arg0: i32, %arg1: i32, %arg2: memref<8x8x196xf32, #tpu.memory_space<vmem>>, %arg3: memref<196x128xf32, #tpu.memory_space<vmem>>, %arg4: memref<1x128xf32, #tpu.memory_space<vmem>>, %arg5: memref<8x128xf32, #tpu.memory_space<vmem>>, %arg6: memref<8x128xf32, #tpu.memory_space<vmem>>, %arg7: memref<8x8x128xf32, #tpu.memory_space<vmem>>, %arg8: memref<8x8x128xf32, #tpu.memory_space<vmem>>, %arg9: memref<8x128xf32, #tpu.memory_space<vmem>>, %arg10: memref<8x128xf32, #tpu.memory_space<vmem>>, %arg11: memref<8x128xf32, #tpu.memory_space<vmem>>, %arg12: memref<8x128xf32, #tpu.memory_space<vmem>>) attributes {dimension_semantics = [#tpu.dimension_semantics<parallel>, #tpu.dimension_semantics<arbitrary>], iteration_bounds = array<i64: 1, 1>, scalar_prefetch = 0 : i64, scratch_operands = 2 : i64, tpu.core_type = #tpu.core_type<tc>, window_params = [{transform_indices = @transform_0, window_bounds = array<i64: 8, 8, 196>}, {pipeline_mode = #tpu.pipeline_mode<synchronous>, transform_indices = @transform_1, window_bounds = array<i64: 196, 128>}, {pipeline_mode = #tpu.pipeline_mode<synchronous>, transform_indices = @transform_2, window_bounds = array<i64: 1, 128>}, {transform_indices = @transform_3, window_bounds = array<i64: 8, 128>}, {transform_indices = @transform_4, window_bounds = array<i64: 8, 128>}, {transform_indices = @transform_5, window_bounds = array<i64: 8, 8, 128>}, {transform_indices = @transform_6, window_bounds = array<i64: 8, 8, 128>}, {transform_indices = @transform_7, window_bounds = array<i64: 8, 128>}, {transform_indices = @transform_8, window_bounds = array<i64: 8, 128>}]} {
    %c0_i32 = arith.constant 0 : i32
    %0 = arith.cmpi eq, %arg1, %c0_i32 : i32
    %1 = arith.extui %0 : i1 to i32
    %c0_i32_0 = arith.constant 0 : i32
    %2 = arith.cmpi ne, %1, %c0_i32_0 : i32
    scf.if %2 {
      %c0_226 = arith.constant 0 : index
      %c0_227 = arith.constant 0 : index
      %254 = vector.load %arg5[%c0_226, %c0_227] : memref<8x128xf32, #tpu.memory_space<vmem>>, vector<8x128xf32>
      %c0_228 = arith.constant 0 : index
      %c0_229 = arith.constant 0 : index
      %255 = vector.load %arg11[%c0_228, %c0_229] : memref<8x128xf32, #tpu.memory_space<vmem>>, vector<8x128xf32>
      tpu.vector_store %arg11[%c0_228, %c0_229], %254 {strides = array<i32>} : memref<8x128xf32, #tpu.memory_space<vmem>>, vector<8x128xf32>,
      %c0_230 = arith.constant 0 : index
      %c0_231 = arith.constant 0 : index
      %256 = vector.load %arg6[%c0_230, %c0_231] : memref<8x128xf32, #tpu.memory_space<vmem>>, vector<8x128xf32>
      %c0_232 = arith.constant 0 : index
      %c0_233 = arith.constant 0 : index
      %257 = vector.load %arg12[%c0_232, %c0_233] : memref<8x128xf32, #tpu.memory_space<vmem>>, vector<8x128xf32>
      tpu.vector_store %arg12[%c0_232, %c0_233], %256 {strides = array<i32>} : memref<8x128xf32, #tpu.memory_space<vmem>>, vector<8x128xf32>,
    } else {
    }
    %c0 = arith.constant 0 : index
    %c0_1 = arith.constant 0 : index
    %3 = vector.load %arg11[%c0, %c0_1] : memref<8x128xf32, #tpu.memory_space<vmem>>, vector<8x128xf32>
    %c0_2 = arith.constant 0 : index
    %c0_3 = arith.constant 0 : index
    %c0_4 = arith.constant 0 : index
    %4 = vector.load %arg7[%c0_2, %c0_3, %c0_4] : memref<8x8x128xf32, #tpu.memory_space<vmem>>, vector<1x8x128xf32>
    %5 = vector.shape_cast %4 : vector<1x8x128xf32> to vector<8x128xf32>
    %6 = vector.shape_cast %3 : vector<8x128xf32> to vector<1x8x128xf32>
    tpu.vector_store %arg7[%c0_2, %c0_3, %c0_4], %6 {strides = array<i32>} : memref<8x8x128xf32, #tpu.memory_space<vmem>>, vector<1x8x128xf32>,
    %c0_5 = arith.constant 0 : index
    %c0_6 = arith.constant 0 : index
    %7 = vector.load %arg12[%c0_5, %c0_6] : memref<8x128xf32, #tpu.memory_space<vmem>>, vector<8x128xf32>
    %c0_7 = arith.constant 0 : index
    %c0_8 = arith.constant 0 : index
    %c0_9 = arith.constant 0 : index
    %8 = vector.load %arg8[%c0_7, %c0_8, %c0_9] : memref<8x8x128xf32, #tpu.memory_space<vmem>>, vector<1x8x128xf32>
    %9 = vector.shape_cast %8 : vector<1x8x128xf32> to vector<8x128xf32>
    %10 = vector.shape_cast %7 : vector<8x128xf32> to vector<1x8x128xf32>
    tpu.vector_store %arg8[%c0_7, %c0_8, %c0_9], %10 {strides = array<i32>} : memref<8x8x128xf32, #tpu.memory_space<vmem>>, vector<1x8x128xf32>,
    %c0_10 = arith.constant 0 : index
    %c0_11 = arith.constant 0 : index
    %c0_12 = arith.constant 0 : index
    %11 = vector.load %arg2[%c0_10, %c0_11, %c0_12] : memref<8x8x196xf32, #tpu.memory_space<vmem>>, vector<1x8x196xf32>
    %12 = vector.shape_cast %11 : vector<1x8x196xf32> to vector<8x196xf32>
    %c0_13 = arith.constant 0 : index
    %c0_14 = arith.constant 0 : index
    %13 = vector.load %arg3[%c0_13, %c0_14] : memref<196x128xf32, #tpu.memory_space<vmem>>, vector<196x128xf32>
    %cst = arith.constant dense<0.000000e+00> : vector<8x128xf32>
    %14 = tpu.matmul %12, %13, %cst {dimension_numbers = #tpu.dot_dimension_numbers<[1], [0], [0], [1], [0, 0, 1, 1], [], []>} : vector<8x196xf32>, vector<196x128xf32>, vector<8x128xf32> -> vector<8x128xf32>
    %c0_15 = arith.constant 0 : index
    %c0_16 = arith.constant 0 : index
    %15 = vector.load %arg4[%c0_15, %c0_16] : memref<1x128xf32, #tpu.memory_space<vmem>>, vector<1x128xf32>
    %16 = vector.broadcast %15 : vector<1x128xf32> to vector<8x128xf32>
    %17 = arith.addf %14, %16 : vector<8x128xf32>
    %c0_17 = arith.constant 0 : index
    %c0_18 = arith.constant 0 : index
    %18 = vector.load %arg11[%c0_17, %c0_18] : memref<8x128xf32, #tpu.memory_space<vmem>>, vector<8x128xf32>
    %cst_19 = arith.constant 0.899999976 : f32
    %19 = vector.broadcast %cst_19 : f32 to vector<8x128xf32>
    %20 = arith.mulf %18, %19 : vector<8x128xf32>
    %21 = arith.addf %17, %20 : vector<8x128xf32>
    %cst_20 = arith.constant 2.000000e+00 : f32
    %22 = vector.broadcast %cst_20 : f32 to vector<8x128xf32>
    %23 = arith.subf %21, %22 : vector<8x128xf32>
    %cst_21 = arith.constant 0.000000e+00 : f32
    %24 = vector.broadcast %cst_21 : f32 to vector<8x128xf32>
    %25 = arith.maximumf %23, %24 : vector<8x128xf32>
    %cst_22 = arith.constant 2.000000e+00 : f32
    %26 = vector.broadcast %cst_22 : f32 to vector<8x128xf32>
    %27 = arith.cmpf ogt, %21, %26 : vector<8x128xf32>
    %cst_23 = arith.constant 1.250000e+00 : f32
    %28 = vector.broadcast %cst_23 : f32 to vector<8x128xf32>
    %29 = arith.mulf %28, %21 : vector<8x128xf32>
    %30 = arith.subf %21, %29 : vector<8x128xf32>
    %31 = arith.select %27, %30, %21 : vector<8x128xi1>, vector<8x128xf32>
    %c0_24 = arith.constant 0 : index
    %c0_25 = arith.constant 0 : index
    %32 = vector.load %arg11[%c0_24, %c0_25] : memref<8x128xf32, #tpu.memory_space<vmem>>, vector<8x128xf32>
    tpu.vector_store %arg11[%c0_24, %c0_25], %31 {strides = array<i32>} : memref<8x128xf32, #tpu.memory_space<vmem>>, vector<8x128xf32>,
    %c0_26 = arith.constant 0 : index
    %c0_27 = arith.constant 0 : index
    %33 = vector.load %arg12[%c0_26, %c0_27] : memref<8x128xf32, #tpu.memory_space<vmem>>, vector<8x128xf32>
    tpu.vector_store %arg12[%c0_26, %c0_27], %25 {strides = array<i32>} : memref<8x128xf32, #tpu.memory_space<vmem>>, vector<8x128xf32>,
    %c0_28 = arith.constant 0 : index
    %c0_29 = arith.constant 0 : index
    %34 = vector.load %arg11[%c0_28, %c0_29] : memref<8x128xf32, #tpu.memory_space<vmem>>, vector<8x128xf32>
    %c1 = arith.constant 1 : index
    %c0_30 = arith.constant 0 : index
    %c0_31 = arith.constant 0 : index
    %35 = vector.load %arg7[%c1, %c0_30, %c0_31] : memref<8x8x128xf32, #tpu.memory_space<vmem>>, vector<1x8x128xf32>
    %36 = vector.shape_cast %35 : vector<1x8x128xf32> to vector<8x128xf32>
    %37 = vector.shape_cast %34 : vector<8x128xf32> to vector<1x8x128xf32>
    tpu.vector_store %arg7[%c1, %c0_30, %c0_31], %37 {strides = array<i32>} : memref<8x8x128xf32, #tpu.memory_space<vmem>>, vector<1x8x128xf32>,
    %c0_32 = arith.constant 0 : index
    %c0_33 = arith.constant 0 : index
    %38 = vector.load %arg12[%c0_32, %c0_33] : memref<8x128xf32, #tpu.memory_space<vmem>>, vector<8x128xf32>
    %c1_34 = arith.constant 1 : index
    %c0_35 = arith.constant 0 : index
    %c0_36 = arith.constant 0 : index
    %39 = vector.load %arg8[%c1_34, %c0_35, %c0_36] : memref<8x8x128xf32, #tpu.memory_space<vmem>>, vector<1x8x128xf32>
    %40 = vector.shape_cast %39 : vector<1x8x128xf32> to vector<8x128xf32>
    %41 = vector.shape_cast %38 : vector<8x128xf32> to vector<1x8x128xf32>
    tpu.vector_store %arg8[%c1_34, %c0_35, %c0_36], %41 {strides = array<i32>} : memref<8x8x128xf32, #tpu.memory_space<vmem>>, vector<1x8x128xf32>,
    %c1_37 = arith.constant 1 : index
    %c0_38 = arith.constant 0 : index
    %c0_39 = arith.constant 0 : index
    %42 = vector.load %arg2[%c1_37, %c0_38, %c0_39] : memref<8x8x196xf32, #tpu.memory_space<vmem>>, vector<1x8x196xf32>
    %43 = vector.shape_cast %42 : vector<1x8x196xf32> to vector<8x196xf32>
    %c0_40 = arith.constant 0 : index
    %c0_41 = arith.constant 0 : index
    %44 = vector.load %arg3[%c0_40, %c0_41] : memref<196x128xf32, #tpu.memory_space<vmem>>, vector<196x128xf32>
    %cst_42 = arith.constant dense<0.000000e+00> : vector<8x128xf32>
    %45 = tpu.matmul %43, %44, %cst_42 {dimension_numbers = #tpu.dot_dimension_numbers<[1], [0], [0], [1], [0, 0, 1, 1], [], []>} : vector<8x196xf32>, vector<196x128xf32>, vector<8x128xf32> -> vector<8x128xf32>
    %c0_43 = arith.constant 0 : index
    %c0_44 = arith.constant 0 : index
    %46 = vector.load %arg4[%c0_43, %c0_44] : memref<1x128xf32, #tpu.memory_space<vmem>>, vector<1x128xf32>
    %47 = vector.broadcast %46 : vector<1x128xf32> to vector<8x128xf32>
    %48 = arith.addf %45, %47 : vector<8x128xf32>
    %c0_45 = arith.constant 0 : index
    %c0_46 = arith.constant 0 : index
    %49 = vector.load %arg11[%c0_45, %c0_46] : memref<8x128xf32, #tpu.memory_space<vmem>>, vector<8x128xf32>
    %cst_47 = arith.constant 0.899999976 : f32
    %50 = vector.broadcast %cst_47 : f32 to vector<8x128xf32>
    %51 = arith.mulf %49, %50 : vector<8x128xf32>
    %52 = arith.addf %48, %51 : vector<8x128xf32>
    %cst_48 = arith.constant 2.000000e+00 : f32
    %53 = vector.broadcast %cst_48 : f32 to vector<8x128xf32>
    %54 = arith.subf %52, %53 : vector<8x128xf32>
    %cst_49 = arith.constant 0.000000e+00 : f32
    %55 = vector.broadcast %cst_49 : f32 to vector<8x128xf32>
    %56 = arith.maximumf %54, %55 : vector<8x128xf32>
    %cst_50 = arith.constant 2.000000e+00 : f32
    %57 = vector.broadcast %cst_50 : f32 to vector<8x128xf32>
    %58 = arith.cmpf ogt, %52, %57 : vector<8x128xf32>
    %cst_51 = arith.constant 1.250000e+00 : f32
    %59 = vector.broadcast %cst_51 : f32 to vector<8x128xf32>
    %60 = arith.mulf %59, %52 : vector<8x128xf32>
    %61 = arith.subf %52, %60 : vector<8x128xf32>
    %62 = arith.select %58, %61, %52 : vector<8x128xi1>, vector<8x128xf32>
    %c0_52 = arith.constant 0 : index
    %c0_53 = arith.constant 0 : index
    %63 = vector.load %arg11[%c0_52, %c0_53] : memref<8x128xf32, #tpu.memory_space<vmem>>, vector<8x128xf32>
    tpu.vector_store %arg11[%c0_52, %c0_53], %62 {strides = array<i32>} : memref<8x128xf32, #tpu.memory_space<vmem>>, vector<8x128xf32>,
    %c0_54 = arith.constant 0 : index
    %c0_55 = arith.constant 0 : index
    %64 = vector.load %arg12[%c0_54, %c0_55] : memref<8x128xf32, #tpu.memory_space<vmem>>, vector<8x128xf32>
    tpu.vector_store %arg12[%c0_54, %c0_55], %56 {strides = array<i32>} : memref<8x128xf32, #tpu.memory_space<vmem>>, vector<8x128xf32>,
    %c0_56 = arith.constant 0 : index
    %c0_57 = arith.constant 0 : index
    %65 = vector.load %arg11[%c0_56, %c0_57] : memref<8x128xf32, #tpu.memory_space<vmem>>, vector<8x128xf32>
    %c2 = arith.constant 2 : index
    %c0_58 = arith.constant 0 : index
    %c0_59 = arith.constant 0 : index
    %66 = vector.load %arg7[%c2, %c0_58, %c0_59] : memref<8x8x128xf32, #tpu.memory_space<vmem>>, vector<1x8x128xf32>
    %67 = vector.shape_cast %66 : vector<1x8x128xf32> to vector<8x128xf32>
    %68 = vector.shape_cast %65 : vector<8x128xf32> to vector<1x8x128xf32>
    tpu.vector_store %arg7[%c2, %c0_58, %c0_59], %68 {strides = array<i32>} : memref<8x8x128xf32, #tpu.memory_space<vmem>>, vector<1x8x128xf32>,
    %c0_60 = arith.constant 0 : index
    %c0_61 = arith.constant 0 : index
    %69 = vector.load %arg12[%c0_60, %c0_61] : memref<8x128xf32, #tpu.memory_space<vmem>>, vector<8x128xf32>
    %c2_62 = arith.constant 2 : index
    %c0_63 = arith.constant 0 : index
    %c0_64 = arith.constant 0 : index
    %70 = vector.load %arg8[%c2_62, %c0_63, %c0_64] : memref<8x8x128xf32, #tpu.memory_space<vmem>>, vector<1x8x128xf32>
    %71 = vector.shape_cast %70 : vector<1x8x128xf32> to vector<8x128xf32>
    %72 = vector.shape_cast %69 : vector<8x128xf32> to vector<1x8x128xf32>
    tpu.vector_store %arg8[%c2_62, %c0_63, %c0_64], %72 {strides = array<i32>} : memref<8x8x128xf32, #tpu.memory_space<vmem>>, vector<1x8x128xf32>,
    %c2_65 = arith.constant 2 : index
    %c0_66 = arith.constant 0 : index
    %c0_67 = arith.constant 0 : index
    %73 = vector.load %arg2[%c2_65, %c0_66, %c0_67] : memref<8x8x196xf32, #tpu.memory_space<vmem>>, vector<1x8x196xf32>
    %74 = vector.shape_cast %73 : vector<1x8x196xf32> to vector<8x196xf32>
    %c0_68 = arith.constant 0 : index
    %c0_69 = arith.constant 0 : index
    %75 = vector.load %arg3[%c0_68, %c0_69] : memref<196x128xf32, #tpu.memory_space<vmem>>, vector<196x128xf32>
    %cst_70 = arith.constant dense<0.000000e+00> : vector<8x128xf32>
    %76 = tpu.matmul %74, %75, %cst_70 {dimension_numbers = #tpu.dot_dimension_numbers<[1], [0], [0], [1], [0, 0, 1, 1], [], []>} : vector<8x196xf32>, vector<196x128xf32>, vector<8x128xf32> -> vector<8x128xf32>
    %c0_71 = arith.constant 0 : index
    %c0_72 = arith.constant 0 : index
    %77 = vector.load %arg4[%c0_71, %c0_72] : memref<1x128xf32, #tpu.memory_space<vmem>>, vector<1x128xf32>
    %78 = vector.broadcast %77 : vector<1x128xf32> to vector<8x128xf32>
    %79 = arith.addf %76, %78 : vector<8x128xf32>
    %c0_73 = arith.constant 0 : index
    %c0_74 = arith.constant 0 : index
    %80 = vector.load %arg11[%c0_73, %c0_74] : memref<8x128xf32, #tpu.memory_space<vmem>>, vector<8x128xf32>
    %cst_75 = arith.constant 0.899999976 : f32
    %81 = vector.broadcast %cst_75 : f32 to vector<8x128xf32>
    %82 = arith.mulf %80, %81 : vector<8x128xf32>
    %83 = arith.addf %79, %82 : vector<8x128xf32>
    %cst_76 = arith.constant 2.000000e+00 : f32
    %84 = vector.broadcast %cst_76 : f32 to vector<8x128xf32>
    %85 = arith.subf %83, %84 : vector<8x128xf32>
    %cst_77 = arith.constant 0.000000e+00 : f32
    %86 = vector.broadcast %cst_77 : f32 to vector<8x128xf32>
    %87 = arith.maximumf %85, %86 : vector<8x128xf32>
    %cst_78 = arith.constant 2.000000e+00 : f32
    %88 = vector.broadcast %cst_78 : f32 to vector<8x128xf32>
    %89 = arith.cmpf ogt, %83, %88 : vector<8x128xf32>
    %cst_79 = arith.constant 1.250000e+00 : f32
    %90 = vector.broadcast %cst_79 : f32 to vector<8x128xf32>
    %91 = arith.mulf %90, %83 : vector<8x128xf32>
    %92 = arith.subf %83, %91 : vector<8x128xf32>
    %93 = arith.select %89, %92, %83 : vector<8x128xi1>, vector<8x128xf32>
    %c0_80 = arith.constant 0 : index
    %c0_81 = arith.constant 0 : index
    %94 = vector.load %arg11[%c0_80, %c0_81] : memref<8x128xf32, #tpu.memory_space<vmem>>, vector<8x128xf32>
    tpu.vector_store %arg11[%c0_80, %c0_81], %93 {strides = array<i32>} : memref<8x128xf32, #tpu.memory_space<vmem>>, vector<8x128xf32>,
    %c0_82 = arith.constant 0 : index
    %c0_83 = arith.constant 0 : index
    %95 = vector.load %arg12[%c0_82, %c0_83] : memref<8x128xf32, #tpu.memory_space<vmem>>, vector<8x128xf32>
    tpu.vector_store %arg12[%c0_82, %c0_83], %87 {strides = array<i32>} : memref<8x128xf32, #tpu.memory_space<vmem>>, vector<8x128xf32>,
    %c0_84 = arith.constant 0 : index
    %c0_85 = arith.constant 0 : index
    %96 = vector.load %arg11[%c0_84, %c0_85] : memref<8x128xf32, #tpu.memory_space<vmem>>, vector<8x128xf32>
    %c3 = arith.constant 3 : index
    %c0_86 = arith.constant 0 : index
    %c0_87 = arith.constant 0 : index
    %97 = vector.load %arg7[%c3, %c0_86, %c0_87] : memref<8x8x128xf32, #tpu.memory_space<vmem>>, vector<1x8x128xf32>
    %98 = vector.shape_cast %97 : vector<1x8x128xf32> to vector<8x128xf32>
    %99 = vector.shape_cast %96 : vector<8x128xf32> to vector<1x8x128xf32>
    tpu.vector_store %arg7[%c3, %c0_86, %c0_87], %99 {strides = array<i32>} : memref<8x8x128xf32, #tpu.memory_space<vmem>>, vector<1x8x128xf32>,
    %c0_88 = arith.constant 0 : index
    %c0_89 = arith.constant 0 : index
    %100 = vector.load %arg12[%c0_88, %c0_89] : memref<8x128xf32, #tpu.memory_space<vmem>>, vector<8x128xf32>
    %c3_90 = arith.constant 3 : index
    %c0_91 = arith.constant 0 : index
    %c0_92 = arith.constant 0 : index
    %101 = vector.load %arg8[%c3_90, %c0_91, %c0_92] : memref<8x8x128xf32, #tpu.memory_space<vmem>>, vector<1x8x128xf32>
    %102 = vector.shape_cast %101 : vector<1x8x128xf32> to vector<8x128xf32>
    %103 = vector.shape_cast %100 : vector<8x128xf32> to vector<1x8x128xf32>
    tpu.vector_store %arg8[%c3_90, %c0_91, %c0_92], %103 {strides = array<i32>} : memref<8x8x128xf32, #tpu.memory_space<vmem>>, vector<1x8x128xf32>,
    %c3_93 = arith.constant 3 : index
    %c0_94 = arith.constant 0 : index
    %c0_95 = arith.constant 0 : index
    %104 = vector.load %arg2[%c3_93, %c0_94, %c0_95] : memref<8x8x196xf32, #tpu.memory_space<vmem>>, vector<1x8x196xf32>
    %105 = vector.shape_cast %104 : vector<1x8x196xf32> to vector<8x196xf32>
    %c0_96 = arith.constant 0 : index
    %c0_97 = arith.constant 0 : index
    %106 = vector.load %arg3[%c0_96, %c0_97] : memref<196x128xf32, #tpu.memory_space<vmem>>, vector<196x128xf32>
    %cst_98 = arith.constant dense<0.000000e+00> : vector<8x128xf32>
    %107 = tpu.matmul %105, %106, %cst_98 {dimension_numbers = #tpu.dot_dimension_numbers<[1], [0], [0], [1], [0, 0, 1, 1], [], []>} : vector<8x196xf32>, vector<196x128xf32>, vector<8x128xf32> -> vector<8x128xf32>
    %c0_99 = arith.constant 0 : index
    %c0_100 = arith.constant 0 : index
    %108 = vector.load %arg4[%c0_99, %c0_100] : memref<1x128xf32, #tpu.memory_space<vmem>>, vector<1x128xf32>
    %109 = vector.broadcast %108 : vector<1x128xf32> to vector<8x128xf32>
    %110 = arith.addf %107, %109 : vector<8x128xf32>
    %c0_101 = arith.constant 0 : index
    %c0_102 = arith.constant 0 : index
    %111 = vector.load %arg11[%c0_101, %c0_102] : memref<8x128xf32, #tpu.memory_space<vmem>>, vector<8x128xf32>
    %cst_103 = arith.constant 0.899999976 : f32
    %112 = vector.broadcast %cst_103 : f32 to vector<8x128xf32>
    %113 = arith.mulf %111, %112 : vector<8x128xf32>
    %114 = arith.addf %110, %113 : vector<8x128xf32>
    %cst_104 = arith.constant 2.000000e+00 : f32
    %115 = vector.broadcast %cst_104 : f32 to vector<8x128xf32>
    %116 = arith.subf %114, %115 : vector<8x128xf32>
    %cst_105 = arith.constant 0.000000e+00 : f32
    %117 = vector.broadcast %cst_105 : f32 to vector<8x128xf32>
    %118 = arith.maximumf %116, %117 : vector<8x128xf32>
    %cst_106 = arith.constant 2.000000e+00 : f32
    %119 = vector.broadcast %cst_106 : f32 to vector<8x128xf32>
    %120 = arith.cmpf ogt, %114, %119 : vector<8x128xf32>
    %cst_107 = arith.constant 1.250000e+00 : f32
    %121 = vector.broadcast %cst_107 : f32 to vector<8x128xf32>
    %122 = arith.mulf %121, %114 : vector<8x128xf32>
    %123 = arith.subf %114, %122 : vector<8x128xf32>
    %124 = arith.select %120, %123, %114 : vector<8x128xi1>, vector<8x128xf32>
    %c0_108 = arith.constant 0 : index
    %c0_109 = arith.constant 0 : index
    %125 = vector.load %arg11[%c0_108, %c0_109] : memref<8x128xf32, #tpu.memory_space<vmem>>, vector<8x128xf32>
    tpu.vector_store %arg11[%c0_108, %c0_109], %124 {strides = array<i32>} : memref<8x128xf32, #tpu.memory_space<vmem>>, vector<8x128xf32>,
    %c0_110 = arith.constant 0 : index
    %c0_111 = arith.constant 0 : index
    %126 = vector.load %arg12[%c0_110, %c0_111] : memref<8x128xf32, #tpu.memory_space<vmem>>, vector<8x128xf32>
    tpu.vector_store %arg12[%c0_110, %c0_111], %118 {strides = array<i32>} : memref<8x128xf32, #tpu.memory_space<vmem>>, vector<8x128xf32>,
    %c0_112 = arith.constant 0 : index
    %c0_113 = arith.constant 0 : index
    %127 = vector.load %arg11[%c0_112, %c0_113] : memref<8x128xf32, #tpu.memory_space<vmem>>, vector<8x128xf32>
    %c4 = arith.constant 4 : index
    %c0_114 = arith.constant 0 : index
    %c0_115 = arith.constant 0 : index
    %128 = vector.load %arg7[%c4, %c0_114, %c0_115] : memref<8x8x128xf32, #tpu.memory_space<vmem>>, vector<1x8x128xf32>
    %129 = vector.shape_cast %128 : vector<1x8x128xf32> to vector<8x128xf32>
    %130 = vector.shape_cast %127 : vector<8x128xf32> to vector<1x8x128xf32>
    tpu.vector_store %arg7[%c4, %c0_114, %c0_115], %130 {strides = array<i32>} : memref<8x8x128xf32, #tpu.memory_space<vmem>>, vector<1x8x128xf32>,
    %c0_116 = arith.constant 0 : index
    %c0_117 = arith.constant 0 : index
    %131 = vector.load %arg12[%c0_116, %c0_117] : memref<8x128xf32, #tpu.memory_space<vmem>>, vector<8x128xf32>
    %c4_118 = arith.constant 4 : index
    %c0_119 = arith.constant 0 : index
    %c0_120 = arith.constant 0 : index
    %132 = vector.load %arg8[%c4_118, %c0_119, %c0_120] : memref<8x8x128xf32, #tpu.memory_space<vmem>>, vector<1x8x128xf32>
    %133 = vector.shape_cast %132 : vector<1x8x128xf32> to vector<8x128xf32>
    %134 = vector.shape_cast %131 : vector<8x128xf32> to vector<1x8x128xf32>
    tpu.vector_store %arg8[%c4_118, %c0_119, %c0_120], %134 {strides = array<i32>} : memref<8x8x128xf32, #tpu.memory_space<vmem>>, vector<1x8x128xf32>,
    %c4_121 = arith.constant 4 : index
    %c0_122 = arith.constant 0 : index
    %c0_123 = arith.constant 0 : index
    %135 = vector.load %arg2[%c4_121, %c0_122, %c0_123] : memref<8x8x196xf32, #tpu.memory_space<vmem>>, vector<1x8x196xf32>
    %136 = vector.shape_cast %135 : vector<1x8x196xf32> to vector<8x196xf32>
    %c0_124 = arith.constant 0 : index
    %c0_125 = arith.constant 0 : index
    %137 = vector.load %arg3[%c0_124, %c0_125] : memref<196x128xf32, #tpu.memory_space<vmem>>, vector<196x128xf32>
    %cst_126 = arith.constant dense<0.000000e+00> : vector<8x128xf32>
    %138 = tpu.matmul %136, %137, %cst_126 {dimension_numbers = #tpu.dot_dimension_numbers<[1], [0], [0], [1], [0, 0, 1, 1], [], []>} : vector<8x196xf32>, vector<196x128xf32>, vector<8x128xf32> -> vector<8x128xf32>
    %c0_127 = arith.constant 0 : index
    %c0_128 = arith.constant 0 : index
    %139 = vector.load %arg4[%c0_127, %c0_128] : memref<1x128xf32, #tpu.memory_space<vmem>>, vector<1x128xf32>
    %140 = vector.broadcast %139 : vector<1x128xf32> to vector<8x128xf32>
    %141 = arith.addf %138, %140 : vector<8x128xf32>
    %c0_129 = arith.constant 0 : index
    %c0_130 = arith.constant 0 : index
    %142 = vector.load %arg11[%c0_129, %c0_130] : memref<8x128xf32, #tpu.memory_space<vmem>>, vector<8x128xf32>
    %cst_131 = arith.constant 0.899999976 : f32
    %143 = vector.broadcast %cst_131 : f32 to vector<8x128xf32>
    %144 = arith.mulf %142, %143 : vector<8x128xf32>
    %145 = arith.addf %141, %144 : vector<8x128xf32>
    %cst_132 = arith.constant 2.000000e+00 : f32
    %146 = vector.broadcast %cst_132 : f32 to vector<8x128xf32>
    %147 = arith.subf %145, %146 : vector<8x128xf32>
    %cst_133 = arith.constant 0.000000e+00 : f32
    %148 = vector.broadcast %cst_133 : f32 to vector<8x128xf32>
    %149 = arith.maximumf %147, %148 : vector<8x128xf32>
    %cst_134 = arith.constant 2.000000e+00 : f32
    %150 = vector.broadcast %cst_134 : f32 to vector<8x128xf32>
    %151 = arith.cmpf ogt, %145, %150 : vector<8x128xf32>
    %cst_135 = arith.constant 1.250000e+00 : f32
    %152 = vector.broadcast %cst_135 : f32 to vector<8x128xf32>
    %153 = arith.mulf %152, %145 : vector<8x128xf32>
    %154 = arith.subf %145, %153 : vector<8x128xf32>
    %155 = arith.select %151, %154, %145 : vector<8x128xi1>, vector<8x128xf32>
    %c0_136 = arith.constant 0 : index
    %c0_137 = arith.constant 0 : index
    %156 = vector.load %arg11[%c0_136, %c0_137] : memref<8x128xf32, #tpu.memory_space<vmem>>, vector<8x128xf32>
    tpu.vector_store %arg11[%c0_136, %c0_137], %155 {strides = array<i32>} : memref<8x128xf32, #tpu.memory_space<vmem>>, vector<8x128xf32>,
    %c0_138 = arith.constant 0 : index
    %c0_139 = arith.constant 0 : index
    %157 = vector.load %arg12[%c0_138, %c0_139] : memref<8x128xf32, #tpu.memory_space<vmem>>, vector<8x128xf32>
    tpu.vector_store %arg12[%c0_138, %c0_139], %149 {strides = array<i32>} : memref<8x128xf32, #tpu.memory_space<vmem>>, vector<8x128xf32>,
    %c0_140 = arith.constant 0 : index
    %c0_141 = arith.constant 0 : index
    %158 = vector.load %arg11[%c0_140, %c0_141] : memref<8x128xf32, #tpu.memory_space<vmem>>, vector<8x128xf32>
    %c5 = arith.constant 5 : index
    %c0_142 = arith.constant 0 : index
    %c0_143 = arith.constant 0 : index
    %159 = vector.load %arg7[%c5, %c0_142, %c0_143] : memref<8x8x128xf32, #tpu.memory_space<vmem>>, vector<1x8x128xf32>
    %160 = vector.shape_cast %159 : vector<1x8x128xf32> to vector<8x128xf32>
    %161 = vector.shape_cast %158 : vector<8x128xf32> to vector<1x8x128xf32>
    tpu.vector_store %arg7[%c5, %c0_142, %c0_143], %161 {strides = array<i32>} : memref<8x8x128xf32, #tpu.memory_space<vmem>>, vector<1x8x128xf32>,
    %c0_144 = arith.constant 0 : index
    %c0_145 = arith.constant 0 : index
    %162 = vector.load %arg12[%c0_144, %c0_145] : memref<8x128xf32, #tpu.memory_space<vmem>>, vector<8x128xf32>
    %c5_146 = arith.constant 5 : index
    %c0_147 = arith.constant 0 : index
    %c0_148 = arith.constant 0 : index
    %163 = vector.load %arg8[%c5_146, %c0_147, %c0_148] : memref<8x8x128xf32, #tpu.memory_space<vmem>>, vector<1x8x128xf32>
    %164 = vector.shape_cast %163 : vector<1x8x128xf32> to vector<8x128xf32>
    %165 = vector.shape_cast %162 : vector<8x128xf32> to vector<1x8x128xf32>
    tpu.vector_store %arg8[%c5_146, %c0_147, %c0_148], %165 {strides = array<i32>} : memref<8x8x128xf32, #tpu.memory_space<vmem>>, vector<1x8x128xf32>,
    %c5_149 = arith.constant 5 : index
    %c0_150 = arith.constant 0 : index
    %c0_151 = arith.constant 0 : index
    %166 = vector.load %arg2[%c5_149, %c0_150, %c0_151] : memref<8x8x196xf32, #tpu.memory_space<vmem>>, vector<1x8x196xf32>
    %167 = vector.shape_cast %166 : vector<1x8x196xf32> to vector<8x196xf32>
    %c0_152 = arith.constant 0 : index
    %c0_153 = arith.constant 0 : index
    %168 = vector.load %arg3[%c0_152, %c0_153] : memref<196x128xf32, #tpu.memory_space<vmem>>, vector<196x128xf32>
    %cst_154 = arith.constant dense<0.000000e+00> : vector<8x128xf32>
    %169 = tpu.matmul %167, %168, %cst_154 {dimension_numbers = #tpu.dot_dimension_numbers<[1], [0], [0], [1], [0, 0, 1, 1], [], []>} : vector<8x196xf32>, vector<196x128xf32>, vector<8x128xf32> -> vector<8x128xf32>
    %c0_155 = arith.constant 0 : index
    %c0_156 = arith.constant 0 : index
    %170 = vector.load %arg4[%c0_155, %c0_156] : memref<1x128xf32, #tpu.memory_space<vmem>>, vector<1x128xf32>
    %171 = vector.broadcast %170 : vector<1x128xf32> to vector<8x128xf32>
    %172 = arith.addf %169, %171 : vector<8x128xf32>
    %c0_157 = arith.constant 0 : index
    %c0_158 = arith.constant 0 : index
    %173 = vector.load %arg11[%c0_157, %c0_158] : memref<8x128xf32, #tpu.memory_space<vmem>>, vector<8x128xf32>
    %cst_159 = arith.constant 0.899999976 : f32
    %174 = vector.broadcast %cst_159 : f32 to vector<8x128xf32>
    %175 = arith.mulf %173, %174 : vector<8x128xf32>
    %176 = arith.addf %172, %175 : vector<8x128xf32>
    %cst_160 = arith.constant 2.000000e+00 : f32
    %177 = vector.broadcast %cst_160 : f32 to vector<8x128xf32>
    %178 = arith.subf %176, %177 : vector<8x128xf32>
    %cst_161 = arith.constant 0.000000e+00 : f32
    %179 = vector.broadcast %cst_161 : f32 to vector<8x128xf32>
    %180 = arith.maximumf %178, %179 : vector<8x128xf32>
    %cst_162 = arith.constant 2.000000e+00 : f32
    %181 = vector.broadcast %cst_162 : f32 to vector<8x128xf32>
    %182 = arith.cmpf ogt, %176, %181 : vector<8x128xf32>
    %cst_163 = arith.constant 1.250000e+00 : f32
    %183 = vector.broadcast %cst_163 : f32 to vector<8x128xf32>
    %184 = arith.mulf %183, %176 : vector<8x128xf32>
    %185 = arith.subf %176, %184 : vector<8x128xf32>
    %186 = arith.select %182, %185, %176 : vector<8x128xi1>, vector<8x128xf32>
    %c0_164 = arith.constant 0 : index
    %c0_165 = arith.constant 0 : index
    %187 = vector.load %arg11[%c0_164, %c0_165] : memref<8x128xf32, #tpu.memory_space<vmem>>, vector<8x128xf32>
    tpu.vector_store %arg11[%c0_164, %c0_165], %186 {strides = array<i32>} : memref<8x128xf32, #tpu.memory_space<vmem>>, vector<8x128xf32>,
    %c0_166 = arith.constant 0 : index
    %c0_167 = arith.constant 0 : index
    %188 = vector.load %arg12[%c0_166, %c0_167] : memref<8x128xf32, #tpu.memory_space<vmem>>, vector<8x128xf32>
    tpu.vector_store %arg12[%c0_166, %c0_167], %180 {strides = array<i32>} : memref<8x128xf32, #tpu.memory_space<vmem>>, vector<8x128xf32>,
    %c0_168 = arith.constant 0 : index
    %c0_169 = arith.constant 0 : index
    %189 = vector.load %arg11[%c0_168, %c0_169] : memref<8x128xf32, #tpu.memory_space<vmem>>, vector<8x128xf32>
    %c6 = arith.constant 6 : index
    %c0_170 = arith.constant 0 : index
    %c0_171 = arith.constant 0 : index
    %190 = vector.load %arg7[%c6, %c0_170, %c0_171] : memref<8x8x128xf32, #tpu.memory_space<vmem>>, vector<1x8x128xf32>
    %191 = vector.shape_cast %190 : vector<1x8x128xf32> to vector<8x128xf32>
    %192 = vector.shape_cast %189 : vector<8x128xf32> to vector<1x8x128xf32>
    tpu.vector_store %arg7[%c6, %c0_170, %c0_171], %192 {strides = array<i32>} : memref<8x8x128xf32, #tpu.memory_space<vmem>>, vector<1x8x128xf32>,
    %c0_172 = arith.constant 0 : index
    %c0_173 = arith.constant 0 : index
    %193 = vector.load %arg12[%c0_172, %c0_173] : memref<8x128xf32, #tpu.memory_space<vmem>>, vector<8x128xf32>
    %c6_174 = arith.constant 6 : index
    %c0_175 = arith.constant 0 : index
    %c0_176 = arith.constant 0 : index
    %194 = vector.load %arg8[%c6_174, %c0_175, %c0_176] : memref<8x8x128xf32, #tpu.memory_space<vmem>>, vector<1x8x128xf32>
    %195 = vector.shape_cast %194 : vector<1x8x128xf32> to vector<8x128xf32>
    %196 = vector.shape_cast %193 : vector<8x128xf32> to vector<1x8x128xf32>
    tpu.vector_store %arg8[%c6_174, %c0_175, %c0_176], %196 {strides = array<i32>} : memref<8x8x128xf32, #tpu.memory_space<vmem>>, vector<1x8x128xf32>,
    %c6_177 = arith.constant 6 : index
    %c0_178 = arith.constant 0 : index
    %c0_179 = arith.constant 0 : index
    %197 = vector.load %arg2[%c6_177, %c0_178, %c0_179] : memref<8x8x196xf32, #tpu.memory_space<vmem>>, vector<1x8x196xf32>
    %198 = vector.shape_cast %197 : vector<1x8x196xf32> to vector<8x196xf32>
    %c0_180 = arith.constant 0 : index
    %c0_181 = arith.constant 0 : index
    %199 = vector.load %arg3[%c0_180, %c0_181] : memref<196x128xf32, #tpu.memory_space<vmem>>, vector<196x128xf32>
    %cst_182 = arith.constant dense<0.000000e+00> : vector<8x128xf32>
    %200 = tpu.matmul %198, %199, %cst_182 {dimension_numbers = #tpu.dot_dimension_numbers<[1], [0], [0], [1], [0, 0, 1, 1], [], []>} : vector<8x196xf32>, vector<196x128xf32>, vector<8x128xf32> -> vector<8x128xf32>
    %c0_183 = arith.constant 0 : index
    %c0_184 = arith.constant 0 : index
    %201 = vector.load %arg4[%c0_183, %c0_184] : memref<1x128xf32, #tpu.memory_space<vmem>>, vector<1x128xf32>
    %202 = vector.broadcast %201 : vector<1x128xf32> to vector<8x128xf32>
    %203 = arith.addf %200, %202 : vector<8x128xf32>
    %c0_185 = arith.constant 0 : index
    %c0_186 = arith.constant 0 : index
    %204 = vector.load %arg11[%c0_185, %c0_186] : memref<8x128xf32, #tpu.memory_space<vmem>>, vector<8x128xf32>
    %cst_187 = arith.constant 0.899999976 : f32
    %205 = vector.broadcast %cst_187 : f32 to vector<8x128xf32>
    %206 = arith.mulf %204, %205 : vector<8x128xf32>
    %207 = arith.addf %203, %206 : vector<8x128xf32>
    %cst_188 = arith.constant 2.000000e+00 : f32
    %208 = vector.broadcast %cst_188 : f32 to vector<8x128xf32>
    %209 = arith.subf %207, %208 : vector<8x128xf32>
    %cst_189 = arith.constant 0.000000e+00 : f32
    %210 = vector.broadcast %cst_189 : f32 to vector<8x128xf32>
    %211 = arith.maximumf %209, %210 : vector<8x128xf32>
    %cst_190 = arith.constant 2.000000e+00 : f32
    %212 = vector.broadcast %cst_190 : f32 to vector<8x128xf32>
    %213 = arith.cmpf ogt, %207, %212 : vector<8x128xf32>
    %cst_191 = arith.constant 1.250000e+00 : f32
    %214 = vector.broadcast %cst_191 : f32 to vector<8x128xf32>
    %215 = arith.mulf %214, %207 : vector<8x128xf32>
    %216 = arith.subf %207, %215 : vector<8x128xf32>
    %217 = arith.select %213, %216, %207 : vector<8x128xi1>, vector<8x128xf32>
    %c0_192 = arith.constant 0 : index
    %c0_193 = arith.constant 0 : index
    %218 = vector.load %arg11[%c0_192, %c0_193] : memref<8x128xf32, #tpu.memory_space<vmem>>, vector<8x128xf32>
    tpu.vector_store %arg11[%c0_192, %c0_193], %217 {strides = array<i32>} : memref<8x128xf32, #tpu.memory_space<vmem>>, vector<8x128xf32>,
    %c0_194 = arith.constant 0 : index
    %c0_195 = arith.constant 0 : index
    %219 = vector.load %arg12[%c0_194, %c0_195] : memref<8x128xf32, #tpu.memory_space<vmem>>, vector<8x128xf32>
    tpu.vector_store %arg12[%c0_194, %c0_195], %211 {strides = array<i32>} : memref<8x128xf32, #tpu.memory_space<vmem>>, vector<8x128xf32>,
    %c0_196 = arith.constant 0 : index
    %c0_197 = arith.constant 0 : index
    %220 = vector.load %arg11[%c0_196, %c0_197] : memref<8x128xf32, #tpu.memory_space<vmem>>, vector<8x128xf32>
    %c7 = arith.constant 7 : index
    %c0_198 = arith.constant 0 : index
    %c0_199 = arith.constant 0 : index
    %221 = vector.load %arg7[%c7, %c0_198, %c0_199] : memref<8x8x128xf32, #tpu.memory_space<vmem>>, vector<1x8x128xf32>
    %222 = vector.shape_cast %221 : vector<1x8x128xf32> to vector<8x128xf32>
    %223 = vector.shape_cast %220 : vector<8x128xf32> to vector<1x8x128xf32>
    tpu.vector_store %arg7[%c7, %c0_198, %c0_199], %223 {strides = array<i32>} : memref<8x8x128xf32, #tpu.memory_space<vmem>>, vector<1x8x128xf32>,
    %c0_200 = arith.constant 0 : index
    %c0_201 = arith.constant 0 : index
    %224 = vector.load %arg12[%c0_200, %c0_201] : memref<8x128xf32, #tpu.memory_space<vmem>>, vector<8x128xf32>
    %c7_202 = arith.constant 7 : index
    %c0_203 = arith.constant 0 : index
    %c0_204 = arith.constant 0 : index
    %225 = vector.load %arg8[%c7_202, %c0_203, %c0_204] : memref<8x8x128xf32, #tpu.memory_space<vmem>>, vector<1x8x128xf32>
    %226 = vector.shape_cast %225 : vector<1x8x128xf32> to vector<8x128xf32>
    %227 = vector.shape_cast %224 : vector<8x128xf32> to vector<1x8x128xf32>
    tpu.vector_store %arg8[%c7_202, %c0_203, %c0_204], %227 {strides = array<i32>} : memref<8x8x128xf32, #tpu.memory_space<vmem>>, vector<1x8x128xf32>,
    %c7_205 = arith.constant 7 : index
    %c0_206 = arith.constant 0 : index
    %c0_207 = arith.constant 0 : index
    %228 = vector.load %arg2[%c7_205, %c0_206, %c0_207] : memref<8x8x196xf32, #tpu.memory_space<vmem>>, vector<1x8x196xf32>
    %229 = vector.shape_cast %228 : vector<1x8x196xf32> to vector<8x196xf32>
    %c0_208 = arith.constant 0 : index
    %c0_209 = arith.constant 0 : index
    %230 = vector.load %arg3[%c0_208, %c0_209] : memref<196x128xf32, #tpu.memory_space<vmem>>, vector<196x128xf32>
    %cst_210 = arith.constant dense<0.000000e+00> : vector<8x128xf32>
    %231 = tpu.matmul %229, %230, %cst_210 {dimension_numbers = #tpu.dot_dimension_numbers<[1], [0], [0], [1], [0, 0, 1, 1], [], []>} : vector<8x196xf32>, vector<196x128xf32>, vector<8x128xf32> -> vector<8x128xf32>
    %c0_211 = arith.constant 0 : index
    %c0_212 = arith.constant 0 : index
    %232 = vector.load %arg4[%c0_211, %c0_212] : memref<1x128xf32, #tpu.memory_space<vmem>>, vector<1x128xf32>
    %233 = vector.broadcast %232 : vector<1x128xf32> to vector<8x128xf32>
    %234 = arith.addf %231, %233 : vector<8x128xf32>
    %c0_213 = arith.constant 0 : index
    %c0_214 = arith.constant 0 : index
    %235 = vector.load %arg11[%c0_213, %c0_214] : memref<8x128xf32, #tpu.memory_space<vmem>>, vector<8x128xf32>
    %cst_215 = arith.constant 0.899999976 : f32
    %236 = vector.broadcast %cst_215 : f32 to vector<8x128xf32>
    %237 = arith.mulf %235, %236 : vector<8x128xf32>
    %238 = arith.addf %234, %237 : vector<8x128xf32>
    %cst_216 = arith.constant 2.000000e+00 : f32
    %239 = vector.broadcast %cst_216 : f32 to vector<8x128xf32>
    %240 = arith.subf %238, %239 : vector<8x128xf32>
    %cst_217 = arith.constant 0.000000e+00 : f32
    %241 = vector.broadcast %cst_217 : f32 to vector<8x128xf32>
    %242 = arith.maximumf %240, %241 : vector<8x128xf32>
    %cst_218 = arith.constant 2.000000e+00 : f32
    %243 = vector.broadcast %cst_218 : f32 to vector<8x128xf32>
    %244 = arith.cmpf ogt, %238, %243 : vector<8x128xf32>
    %cst_219 = arith.constant 1.250000e+00 : f32
    %245 = vector.broadcast %cst_219 : f32 to vector<8x128xf32>
    %246 = arith.mulf %245, %238 : vector<8x128xf32>
    %247 = arith.subf %238, %246 : vector<8x128xf32>
    %248 = arith.select %244, %247, %238 : vector<8x128xi1>, vector<8x128xf32>
    %c0_220 = arith.constant 0 : index
    %c0_221 = arith.constant 0 : index
    %249 = vector.load %arg11[%c0_220, %c0_221] : memref<8x128xf32, #tpu.memory_space<vmem>>, vector<8x128xf32>
    tpu.vector_store %arg11[%c0_220, %c0_221], %248 {strides = array<i32>} : memref<8x128xf32, #tpu.memory_space<vmem>>, vector<8x128xf32>,
    %c0_222 = arith.constant 0 : index
    %c0_223 = arith.constant 0 : index
    %250 = vector.load %arg12[%c0_222, %c0_223] : memref<8x128xf32, #tpu.memory_space<vmem>>, vector<8x128xf32>
    tpu.vector_store %arg12[%c0_222, %c0_223], %242 {strides = array<i32>} : memref<8x128xf32, #tpu.memory_space<vmem>>, vector<8x128xf32>,
    %c0_i32_224 = arith.constant 0 : i32
    %251 = arith.cmpi eq, %arg1, %c0_i32_224 : i32
    %252 = arith.extui %251 : i1 to i32
    %c0_i32_225 = arith.constant 0 : i32
    %253 = arith.cmpi ne, %252, %c0_i32_225 : i32
    scf.if %253 {
      %c0_226 = arith.constant 0 : index
      %c0_227 = arith.constant 0 : index
      %254 = vector.load %arg11[%c0_226, %c0_227] : memref<8x128xf32, #tpu.memory_space<vmem>>, vector<8x128xf32>
      %c0_228 = arith.constant 0 : index
      %c0_229 = arith.constant 0 : index
      %255 = vector.load %arg9[%c0_228, %c0_229] : memref<8x128xf32, #tpu.memory_space<vmem>>, vector<8x128xf32>
      tpu.vector_store %arg9[%c0_228, %c0_229], %254 {strides = array<i32>} : memref<8x128xf32, #tpu.memory_space<vmem>>, vector<8x128xf32>,
      %c0_230 = arith.constant 0 : index
      %c0_231 = arith.constant 0 : index
      %256 = vector.load %arg12[%c0_230, %c0_231] : memref<8x128xf32, #tpu.memory_space<vmem>>, vector<8x128xf32>
      %c0_232 = arith.constant 0 : index
      %c0_233 = arith.constant 0 : index
      %257 = vector.load %arg10[%c0_232, %c0_233] : memref<8x128xf32, #tpu.memory_space<vmem>>, vector<8x128xf32>
      tpu.vector_store %arg10[%c0_232, %c0_233], %256 {strides = array<i32>} : memref<8x128xf32, #tpu.memory_space<vmem>>, vector<8x128xf32>,
    } else {
    }
    return
  }
  func.func @transform_0(%arg0: i32, %arg1: i32) -> (i32, i32, i32) {
    %c0_i32 = arith.constant 0 : i32
    %c0_i32_0 = arith.constant 0 : i32
    return %arg1, %arg0, %c0_i32 : i32, i32, i32
  }
  func.func @transform_1(%arg0: i32, %arg1: i32) -> (i32, i32) {
    %c0_i32 = arith.constant 0 : i32
    %c0_i32_0 = arith.constant 0 : i32
    %c0_i32_1 = arith.constant 0 : i32
    return %c0_i32, %c0_i32_0 : i32, i32
  }
  func.func @transform_2(%arg0: i32, %arg1: i32) -> (i32, i32) {
    %c0_i32 = arith.constant 0 : i32
    %c0_i32_0 = arith.constant 0 : i32
    %c0_i32_1 = arith.constant 0 : i32
    return %c0_i32, %c0_i32_0 : i32, i32
  }
  func.func @transform_3(%arg0: i32, %arg1: i32) -> (i32, i32) {
    %c0_i32 = arith.constant 0 : i32
    %c0_i32_0 = arith.constant 0 : i32
    return %arg0, %c0_i32 : i32, i32
  }
  func.func @transform_4(%arg0: i32, %arg1: i32) -> (i32, i32) {
    %c0_i32 = arith.constant 0 : i32
    %c0_i32_0 = arith.constant 0 : i32
    return %arg0, %c0_i32 : i32, i32
  }
  func.func @transform_5(%arg0: i32, %arg1: i32) -> (i32, i32, i32) {
    %c0_i32 = arith.constant 0 : i32
    %c0_i32_0 = arith.constant 0 : i32
    return %arg1, %arg0, %c0_i32 : i32, i32, i32
  }
  func.func @transform_6(%arg0: i32, %arg1: i32) -> (i32, i32, i32) {
    %c0_i32 = arith.constant 0 : i32
    %c0_i32_0 = arith.constant 0 : i32
    return %arg1, %arg0, %c0_i32 : i32, i32, i32
  }
  func.func @transform_7(%arg0: i32, %arg1: i32) -> (i32, i32) {
    %c0_i32 = arith.constant 0 : i32
    %c0_i32_0 = arith.constant 0 : i32
    return %arg0, %c0_i32 : i32, i32
  }
  func.func @transform_8(%arg0: i32, %arg1: i32) -> (i32, i32) {
    %c0_i32 = arith.constant 0 : i32
    %c0_i32_0 = arith.constant 0 : i32
    return %arg0, %c0_i32 : i32, i32
  }
}

</mosaic_0001>

<bundles_post_ra>
// kernel: tpu_custom_call.1
= control target key start
LH: loop header
LB: loop body
LE: loop exit
PB: predicated region body
PF: predicated region fallthrough
CT: control target
= control target key end

     0   :  { %14 = vsyncpa [#allocation5], 0  ;;  %s1548_s0 = inlined_call_operand.hbm [shape: f32[8,8,196], index: 0, kind: input, shape index: {}]   ;;  %s1549_s1 = inlined_call_operand.hbm [shape: f32[196,128], index: 1, kind: input, shape index: {}]   ;;  %s1550_s2 = inlined_call_operand.vmem [shape: f32[1,128], index: 2, kind: input, shape index: {}]   ;;  %s1551_s3 = inlined_call_operand.hbm [shape: f32[8,128], index: 3, kind: input, shape index: {}]   ;;  %s1552_s4 = inlined_call_operand.hbm [shape: f32[8,128], index: 4, kind: input, shape index: {}]   ;;  %s1553_s5 = inlined_call_operand.hbm [shape: f32[8,8,128], index: 5, kind: output, shape index: {0}]   ;;  %s1554_s6 = inlined_call_operand.hbm [shape: f32[8,8,128], index: 6, kind: output, shape index: {1}]   ;;  %s1555_s7 = inlined_call_operand.hbm [shape: f32[8,128], index: 7, kind: output, shape index: {2}]   ;;  %s1556_s8 = inlined_call_operand.hbm [shape: f32[8,128], index: 8, kind: output, shape index: {3}]  }
   0x1   :  { %15 = vsyncpa [#allocation8], 0 }
   0x2   :  { %16 = vsyncpa [#allocation11], 0 }
   0x3   :  { %17 = vsyncpa [#allocation6], 0 }
   0x4   :  { %18 = vsyncpa [#allocation14], 0  ;;  %s37_s29 = sshll.u32 %s1549_s1, 4  ;;  %s38_s29 = int_to_ptr.hbm [resolvable:$true] %s37_s29 }
   0x5   :  { %19 = vsyncpa [#allocation17], 0  ;;  %s1178_s30 = smov [#allocation7]   ;;  %s24_s12 = sshll.u32 %s1548_s0, 4  ;;  %s25_s12 = int_to_ptr.hbm [resolvable:$true] %s24_s12 }
   0x6   :  { %s39_s9 = sshll.u32 %s1178_s30, 4  ;;  %s1179_s13 = smov 128   ;;  %s40_s9 = int_to_ptr.vmem [resolvable:$true] %s39_s9 }
   0x7   :  { %s1180_s14 = smov 8   ;;  %s1181_s15 = smov [#allocation4]  }
   0x8   :  { %45 = dma.hbm_to_vmem [thread:$0]  %s38_s29, 3200, %s40_s9, [#allocation8], %s1179_s13, %s1179_s13, %s1180_s14  }
   0x9   :  { %s26_s16 = sshll.u32 %s1181_s15, 4  ;;  %s1182_s1 = smov 256   ;;  %s27_s16 = int_to_ptr.vmem [resolvable:$true] %s26_s16 }
   0xa   :  { %s1183_s17 = smov 16   ;;  %s53_s20 = sshll.u32 %s1551_s3, 4  ;;  %s54_s20 = int_to_ptr.hbm [resolvable:$true] %s53_s20 }
   0xb   :  { %32 = dma.hbm_to_vmem [thread:$0]  %s25_s12, 2048, %s27_s16, [#allocation5], %s1182_s1, %s1182_s1, %s1183_s17  }
   0xc   :  { %s1184_s21 = smov [#allocation9]   ;;  %s64_s24 = sshll.u32 %s1552_s4, 4  ;;  %s65_s24 = int_to_ptr.hbm [resolvable:$true] %s64_s24 }
   0xd   :  { %s55_s0 = sshll.u32 %s1184_s21, 4  ;;  %s1185_s25 = smov [#allocation10]   ;;  %s56_s0 = int_to_ptr.vmem [resolvable:$true] %s55_s0 }
   0xe   :  { %58 = dma.hbm_to_vmem [thread:$0]  %s54_s20, 128, %s56_s0, [#allocation8]  }
   0xf   :  { %s66_s26 = sshll.u32 %s1185_s25, 4  ;;  %s67_s26 = int_to_ptr.vmem [resolvable:$true] %s66_s26 }
  0x10   :  { %69 = dma.hbm_to_vmem [thread:$0]  %s65_s24, 128, %s67_s26, [#allocation11]  }
  0x11   :  { %1166 = dma.done.wait [#allocation5], 2048  }
  0x12   :  { %1167 = vsyncadd [#allocation5], 4294965248 }
  0x13   :  { %1168 = dma.done.wait [#allocation8], 3328  }
  0x14   :  { %1169 = vsyncadd [#allocation8], 4294963968 }
  0x15   :  { %1170 = dma.done.wait [#allocation11], 128  }
  0x16   :  { %1171 = vsyncadd [#allocation11], 4294967168  ;;  %vm133_vm0 = vcmask 1043456   ;;  %v1250_v0 = vld [vmem:[#allocation7 + $0x78] sm:$0xff]  ;;  %v221_v1 = vld [vmem:[#allocation7 + $0xc0] sm:$0xf] }
  0x17   :  { %v124_v2 = vld [vmem:[#allocation7 + $0xc0] sm:$0xf]  ;;  %137 = vmatpush.msra.mxu0 %v1250_v0  ;;  %933 = vmatpush.msk.msra.mxu3 %vm133_vm0, %v221_v1  ;;  %v1254_v3 = vld [vmem:[#allocation7 + $0x70] sm:$0xff]  ;;  %v1256_v4 = vld [vmem:[#allocation7 + $0xb8] sm:$0xff]  ;;  %vm129_vm1 = vcmask 556032   ;;  %s1186_s20 = smov [#allocation13]  }
  0x18   :  { %930 = vmatpush.msk.msra.mxu1 %vm133_vm0, %v124_v2  ;;  %232 = vmatpush.msra.mxu2 %v1250_v0  ;;  %v1260_v5 = vld [vmem:[#allocation7 + $0x68] sm:$0xff]  ;;  %v1262_v6 = vld [vmem:[#allocation7 + $0xb0] sm:$0xff]  ;;  %v1268_v7 = vld [vmem:[#allocation7 + $0x60] sm:$0xff]  ;;  %s877_s21 = sshll.u32 %s1186_s20, 4  ;;  %s879_s23 = sshll.u32 %s1554_s6, 4  ;;  %s878_s21 = int_to_ptr.vmem [resolvable:$true] %s877_s21  ;;  %s880_s23 = int_to_ptr.hbm [resolvable:$true] %s879_s23 }
  0x19   :  { %138 = vmatpush.msra.mxu0 %v1254_v3  ;;  %260 = vmatpush.msra.mxu3 %v1256_v4  ;;  %v1270_v8 = vld [vmem:[#allocation7 + $0xa8] sm:$0xff]  ;;  %v1276_v9 = vld [vmem:[#allocation7 + $0x58] sm:$0xff]  ;;  %v1278_v10 = vld [vmem:[#allocation7 + $0xa0] sm:$0xff]  ;;  %s1187_s24 = smov [#allocation12]   ;;  %s904_s28 = sshll.u32 %s1556_s8, 4  ;;  %s905_s28 = int_to_ptr.hbm [resolvable:$true] %s904_s28 }
  0x1a   :  { %165 = vmatpush.msra.mxu1 %v1256_v4  ;;  %233 = vmatpush.msra.mxu2 %v1254_v3  ;;  %v1284_v11 = vld [vmem:[#allocation7 + $0x50] sm:$0xff]  ;;  %v1286_v12 = vld [vmem:[#allocation7 + $0x98] sm:$0xff]  ;;  %v1290_v13 = vld [vmem:[#allocation7 + $0x48] sm:$0xff]  ;;  %s864_s25 = sshll.u32 %s1187_s24, 4  ;;  %s1189_s29 = smov [#allocation15]   ;;  %s865_s25 = int_to_ptr.vmem [resolvable:$true] %s864_s25 }
  0x1b   :  { %139 = vmatpush.msra.mxu0 %v1260_v5  ;;  %261 = vmatpush.msra.mxu3 %v1262_v6  ;;  %v1292_v14 = vld [vmem:[#allocation7 + $0x90] sm:$0xff]  ;;  %v1296_v15 = vld [vmem:[#allocation7 + $0x40] sm:$0xff]  ;;  %v1298_v16 = vld [vmem:[#allocation7 + $0x88] sm:$0xff]  ;;  %s891_s30 = sshll.u32 %s1189_s29, 4  ;;  %s893_s11 = sshll.u32 %s1555_s7, 4  ;;  %s892_s30 = int_to_ptr.vmem [resolvable:$true] %s891_s30  ;;  %s894_s11 = int_to_ptr.hbm [resolvable:$true] %s893_s11 }
  0x1c   :  { %166 = vmatpush.msra.mxu1 %v1262_v6  ;;  %234 = vmatpush.msra.mxu2 %v1260_v5  ;;  %v1308_v17 = vld [vmem:[#allocation7 + $0x38] sm:$0xff]  ;;  %v1310_v18 = vld [vmem:[#allocation7 + $0x80] sm:$0xff]  ;;  %v1316_v20 = vld [vmem:[#allocation7 + $0x30] sm:$0xff] }
  0x1d   :  { %140 = vmatpush.msra.mxu0 %v1268_v7  ;;  %262 = vmatpush.msra.mxu3 %v1270_v8  ;;  %v316_v19 = vld [vmem:[#allocation7 + $0xc0] sm:$0xf]  ;;  %v1322_v21 = vld [vmem:[#allocation7 + $0x28] sm:$0xff]  ;;  %v1334_v23 = vld [vmem:[#allocation7 + $0x18] sm:$0xff] }
  0x1e   :  { %167 = vmatpush.msra.mxu1 %v1270_v8  ;;  %235 = vmatpush.msra.mxu2 %v1268_v7  ;;  %v1328_v22 = vld [vmem:[#allocation7 + $0x20] sm:$0xff]  ;;  %v1340_v24 = vld [vmem:[#allocation7 + $0x10] sm:$0xff]  ;;  %v1346_v25 = vld [vmem:[#allocation7 + $0x8] sm:$0xff] }
  0x1f   :  { %141 = vmatpush.msra.mxu0 %v1276_v9  ;;  %263 = vmatpush.msra.mxu3 %v1278_v10  ;;  %v1352_v26 = vld [vmem:[#allocation7] sm:$0xff]  ;;  %v195_v28 = vld [vmem:[#allocation4 + $0x10] sm:$0xff]  ;;  %v99_v30 = vld [vmem:[#allocation4 + $0x8] sm:$0xff] }
  0x20   :  { %168 = vmatpush.msra.mxu1 %v1278_v10  ;;  %236 = vmatpush.msra.mxu2 %v1276_v9  ;;  %v98_v27 = vld [vmem:[#allocation4] sm:$0xff]  ;;  %v196_v31 = vld [vmem:[#allocation4 + $0x18] sm:$0xff]  ;;  %v291_v32 = vld [vmem:[#allocation4 + $0x28] sm:$0xff] }
  0x21   :  { %142 = vmatpush.msra.mxu0 %v1284_v11  ;;  %264 = vmatpush.msra.mxu3 %v1286_v12  ;;  %v411_v29 = vld [vmem:[#allocation7 + $0xc0] sm:$0xf]  ;;  %v386_v35 = vld [vmem:[#allocation4 + $0x38] sm:$0xff]  ;;  %v385_v36 = vld [vmem:[#allocation4 + $0x30] sm:$0xff] }
  0x22   :  { %169 = vmatpush.msra.mxu1 %v1286_v12  ;;  %237 = vmatpush.msra.mxu2 %v1284_v11  ;;  %v290_v33 = vld [vmem:[#allocation4 + $0x20] sm:$0xff]  ;;  %v481_v39 = vld [vmem:[#allocation4 + $0x48] sm:$0xff]  ;;  %v575_v40 = vld [vmem:[#allocation4 + $0x50] sm:$0xff] }
  0x23   :  { %143 = vmatpush.msra.mxu0 %v1290_v13  ;;  %265 = vmatpush.msra.mxu3 %v1292_v14  ;;  %v506_v34 = vld [vmem:[#allocation7 + $0xc0] sm:$0xf]  ;;  %v576_v42 = vld [vmem:[#allocation4 + $0x58] sm:$0xff]  ;;  %v671_v46 = vld [vmem:[#allocation4 + $0x68] sm:$0xff] }
  0x24   :  { %170 = vmatpush.msra.mxu1 %v1292_v14  ;;  %238 = vmatpush.msra.mxu2 %v1290_v13  ;;  %v480_v37 = vld [vmem:[#allocation4 + $0x40] sm:$0xff]  ;;  %v766_v44 = vld [vmem:[#allocation4 + $0x78] sm:$0xff]  ;;  %v765_v47 = vld [vmem:[#allocation4 + $0x70] sm:$0xff] }
  0x25   :  { %144 = vmatpush.msra.mxu0 %v1296_v15  ;;  %266 = vmatpush.msra.mxu3 %v1298_v16  ;;  %v601_v38 = vld [vmem:[#allocation7 + $0xc0] sm:$0xf]  ;;  %v90_v48 = vld [vmem:[#allocation9] sm:$0xff] }
  0x26   :  { %171 = vmatpush.msra.mxu1 %v1298_v16  ;;  %239 = vmatpush.msra.mxu2 %v1296_v15  ;;  %v791_v41 = vld [vmem:[#allocation7 + $0xc0] sm:$0xf]  ;;  %95 = vst [vmem:[#allocation12] sm:$0xff] %v90_v48  ;;  %v178_v52 = vmul.f32 0.9, %v90_v48  ;;  %v92_v48 = vld [vmem:[#allocation10] sm:$0xff] }
  0x27   :  { %145 = vmatpush.msra.mxu0 %v1308_v17  ;;  %267 = vmatpush.msra.mxu3 %v1310_v18  ;;  %v696_v43 = vld [vmem:[#allocation7 + $0xc0] sm:$0xf]  ;;  %97 = vst [vmem:[#allocation13] sm:$0xff] %v92_v48 }
  0x28   :  { %172 = vmatpush.msra.mxu1 %v1310_v18  ;;  %240 = vmatpush.msra.mxu2 %v1308_v17  ;;  %v670_v45 = vld [vmem:[#allocation4 + $0x60] sm:$0xff] }
  0x29   :  { %936 = vmatpush.msk.msrb.mxu3 %vm133_vm0, %v316_v19  ;;  %146 = vmatpush.msra.mxu0 %v1316_v20  ;;  %v966_v49 = vld [vmem:[%s1550_s2] ss:$0 sm:$0xff] }
  0x2a   :  { %327 = vmatpush.msrb.mxu1 %v1250_v0  ;;  %241 = vmatpush.msra.mxu2 %v1316_v20  ;;  %v967_v55 = vld [vmem:[%s1550_s2] ss:$0 sm:$0xff] }
  0x2b   :  { %355 = vmatpush.msrb.mxu3 %v1256_v4  ;;  %147 = vmatpush.msra.mxu0 %v1322_v21 }
  0x2c   :  { %328 = vmatpush.msrb.mxu1 %v1254_v3  ;;  %242 = vmatpush.msra.mxu2 %v1322_v21 }
  0x2d   :  { %356 = vmatpush.msrb.mxu3 %v1262_v6  ;;  %148 = vmatpush.msra.mxu0 %v1328_v22 }
  0x2e   :  { %329 = vmatpush.msrb.mxu1 %v1260_v5  ;;  %243 = vmatpush.msra.mxu2 %v1328_v22 }
  0x2f   :  { %357 = vmatpush.msrb.mxu3 %v1270_v8  ;;  %149 = vmatpush.msra.mxu0 %v1334_v23 }
  0x30   :  { %330 = vmatpush.msrb.mxu1 %v1268_v7  ;;  %244 = vmatpush.msra.mxu2 %v1334_v23 }
  0x31   :  { %358 = vmatpush.msrb.mxu3 %v1278_v10  ;;  %150 = vmatpush.msra.mxu0 %v1340_v24 }
  0x32   :  { %331 = vmatpush.msrb.mxu1 %v1276_v9  ;;  %245 = vmatpush.msra.mxu2 %v1340_v24 }
  0x33   :  { %359 = vmatpush.msrb.mxu3 %v1286_v12  ;;  %151 = vmatpush.msra.mxu0 %v1346_v25 }
  0x34   :  { %332 = vmatpush.msrb.mxu1 %v1284_v11  ;;  %246 = vmatpush.msra.mxu2 %v1346_v25 }
  0x35   :  { %360 = vmatpush.msrb.mxu3 %v1292_v14  ;;  %152 = vmatpush.msra.mxu0 %v1352_v26 }
  0x36   :  { %333 = vmatpush.msrb.mxu1 %v1290_v13  ;;  %153 = vmatmul.f32.vlgmr.msra.gmra.mxu0 %v98_v27 }
  0x37   :  { %247 = vmatpush.msra.mxu2 %v1352_v26  ;;  %361 = vmatpush.msrb.mxu3 %v1298_v16 }
  0x38   :  { %422 = vmatpush.msrb.mxu0 %v1250_v0  ;;  %248 = vmatmul.f32.vlgmr.msra.gmra.mxu2 %v195_v28 }
  0x39   :  { %334 = vmatpush.msrb.mxu1 %v1296_v15  ;;  %939 = vmatpush.msk.msrb.mxu2 %vm133_vm0, %v411_v29  ;;  %v970_v29 = vld [vmem:[%s1550_s2] ss:$0 sm:$0xff] }
  0x3a   :  { %931 = vmatmul.msk.f32.vlgmr.msra.gmra.mxu1 %vm129_vm1, %v99_v30  ;;  %362 = vmatpush.msrb.mxu3 %v1310_v18 }
  0x3b   :  { %423 = vmatpush.msrb.mxu0 %v1254_v3  ;;  %934 = vmatmul.msk.f32.vlgmr.msra.gmra.mxu3 %vm129_vm1, %v196_v31 }
  0x3c   :  { %335 = vmatpush.msrb.mxu1 %v1308_v17  ;;  %450 = vmatpush.msrb.mxu2 %v1256_v4 }
  0x3d   :  { %517 = vmatpush.msra.mxu3 %v1250_v0  ;;  %424 = vmatpush.msrb.mxu0 %v1260_v5 }
  0x3e   :  { %336 = vmatpush.msrb.mxu1 %v1316_v20  ;;  %451 = vmatpush.msrb.mxu2 %v1262_v6 }
  0x3f   :  { %518 = vmatpush.msra.mxu3 %v1254_v3  ;;  %425 = vmatpush.msrb.mxu0 %v1268_v7 }
  0x40   :  { %337 = vmatpush.msrb.mxu1 %v1322_v21  ;;  %452 = vmatpush.msrb.mxu2 %v1270_v8 }
  0x41   :  { %519 = vmatpush.msra.mxu3 %v1260_v5  ;;  %426 = vmatpush.msrb.mxu0 %v1276_v9 }
  0x42   :  { %338 = vmatpush.msrb.mxu1 %v1328_v22  ;;  %453 = vmatpush.msrb.mxu2 %v1278_v10 }
  0x43   :  { %520 = vmatpush.msra.mxu3 %v1268_v7  ;;  %427 = vmatpush.msrb.mxu0 %v1284_v11 }
  0x44   :  { %339 = vmatpush.msrb.mxu1 %v1334_v23  ;;  %454 = vmatpush.msrb.mxu2 %v1286_v12 }
  0x45   :  { %521 = vmatpush.msra.mxu3 %v1276_v9  ;;  %428 = vmatpush.msrb.mxu0 %v1290_v13 }
  0x46   :  { %340 = vmatpush.msrb.mxu1 %v1340_v24  ;;  %455 = vmatpush.msrb.mxu2 %v1292_v14 }
  0x47   :  { %522 = vmatpush.msra.mxu3 %v1284_v11  ;;  %429 = vmatpush.msrb.mxu0 %v1296_v15 }
  0x48   :  { %937 = vmatmul.msk.f32.vlgmr.msrb.gmra.mxu3 %vm129_vm1, %v291_v32  ;;  %341 = vmatpush.msrb.mxu1 %v1346_v25 }
  0x49   :  { %456 = vmatpush.msrb.mxu2 %v1298_v16  ;;  %523 = vmatpush.msra.mxu3 %v1290_v13 }
  0x4a   :  { %430 = vmatpush.msrb.mxu0 %v1308_v17  ;;  %342 = vmatpush.msrb.mxu1 %v1352_v26 }
  0x4b   :  { %457 = vmatpush.msrb.mxu2 %v1310_v18  ;;  %524 = vmatpush.msra.mxu3 %v1296_v15 }
  0x4c   :  { %343 = vmatmul.f32.vlgmr.msrb.gmra.mxu1 %v290_v33  ;;  %431 = vmatpush.msrb.mxu0 %v1316_v20 }
  0x4d   :  { %612 = vmatpush.msra.mxu2 %v1250_v0  ;;  %525 = vmatpush.msra.mxu3 %v1308_v17 }
  0x4e   :  { %432 = vmatpush.msrb.mxu0 %v1322_v21  ;;  %942 = vmatpush.msk.msra.mxu1 %vm133_vm0, %v506_v34 }
  0x4f   :  { %613 = vmatpush.msra.mxu2 %v1254_v3  ;;  %526 = vmatpush.msra.mxu3 %v1316_v20 }
  0x50   :  { %433 = vmatpush.msrb.mxu0 %v1328_v22  ;;  %545 = vmatpush.msra.mxu1 %v1256_v4 }
  0x51   :  { %614 = vmatpush.msra.mxu2 %v1260_v5  ;;  %527 = vmatpush.msra.mxu3 %v1322_v21 }
  0x52   :  { %434 = vmatpush.msrb.mxu0 %v1334_v23  ;;  %940 = vmatmul.msk.f32.vlgmr.msrb.gmra.mxu2 %vm129_vm1, %v386_v35 }
  0x53   :  { %615 = vmatpush.msra.mxu2 %v1268_v7  ;;  %528 = vmatpush.msra.mxu3 %v1328_v22 }
  0x54   :  { %435 = vmatpush.msrb.mxu0 %v1340_v24  ;;  %546 = vmatpush.msra.mxu1 %v1262_v6 }
  0x55   :  { %616 = vmatpush.msra.mxu2 %v1276_v9  ;;  %529 = vmatpush.msra.mxu3 %v1334_v23 }
  0x56   :  { %436 = vmatpush.msrb.mxu0 %v1346_v25  ;;  %547 = vmatpush.msra.mxu1 %v1270_v8 }
  0x57   :  { %617 = vmatpush.msra.mxu2 %v1284_v11  ;;  %530 = vmatpush.msra.mxu3 %v1340_v24 }
  0x58   :  { %437 = vmatpush.msrb.mxu0 %v1352_v26  ;;  %548 = vmatpush.msra.mxu1 %v1278_v10 }
  0x59   :  { %618 = vmatpush.msra.mxu2 %v1290_v13  ;;  %438 = vmatmul.f32.vlgmr.msrb.gmra.mxu0 %v385_v36 }
  0x5a   :  { %531 = vmatpush.msra.mxu3 %v1346_v25  ;;  %549 = vmatpush.msra.mxu1 %v1286_v12 }
  0x5b   :  { %619 = vmatpush.msra.mxu2 %v1296_v15  ;;  %802 = vmatpush.msra.mxu0 %v1250_v0 }
  0x5c   :  { %532 = vmatpush.msra.mxu3 %v1352_v26  ;;  %550 = vmatpush.msra.mxu1 %v1292_v14 }
  0x5d   :  { %533 = vmatmul.f32.vlgmr.msra.gmra.mxu3 %v480_v37  ;;  %620 = vmatpush.msra.mxu2 %v1308_v17 }
  0x5e   :  { %945 = vmatpush.msk.msrb.mxu3 %vm133_vm0, %v601_v38  ;;  %551 = vmatpush.msra.mxu1 %v1298_v16 }
  0x5f   :  { %621 = vmatpush.msra.mxu2 %v1316_v20  ;;  %803 = vmatpush.msra.mxu0 %v1254_v3 }
  0x60   :  { %640 = vmatpush.msrb.mxu3 %v1256_v4  ;;  %552 = vmatpush.msra.mxu1 %v1310_v18 }
  0x61   :  { %622 = vmatpush.msra.mxu2 %v1322_v21  ;;  %943 = vmatmul.msk.f32.vlgmr.msra.gmra.mxu1 %vm129_vm1, %v481_v39 }
  0x62   :  { %707 = vmatpush.msrb.mxu1 %v1250_v0  ;;  %641 = vmatpush.msrb.mxu3 %v1262_v6 }
  0x63   :  { %623 = vmatpush.msra.mxu2 %v1328_v22  ;;  %804 = vmatpush.msra.mxu0 %v1260_v5 }
  0x64   :  { %708 = vmatpush.msrb.mxu1 %v1254_v3  ;;  %642 = vmatpush.msrb.mxu3 %v1270_v8 }
  0x65   :  { %624 = vmatpush.msra.mxu2 %v1334_v23  ;;  %805 = vmatpush.msra.mxu0 %v1268_v7 }
  0x66   :  { %709 = vmatpush.msrb.mxu1 %v1260_v5  ;;  %643 = vmatpush.msrb.mxu3 %v1278_v10 }
  0x67   :  { %625 = vmatpush.msra.mxu2 %v1340_v24  ;;  %806 = vmatpush.msra.mxu0 %v1276_v9 }
  0x68   :  { %710 = vmatpush.msrb.mxu1 %v1268_v7  ;;  %644 = vmatpush.msrb.mxu3 %v1286_v12 }
  0x69   :  { %626 = vmatpush.msra.mxu2 %v1346_v25  ;;  %807 = vmatpush.msra.mxu0 %v1284_v11 }
  0x6a   :  { %711 = vmatpush.msrb.mxu1 %v1276_v9  ;;  %645 = vmatpush.msrb.mxu3 %v1292_v14 }
  0x6b   :  { %627 = vmatpush.msra.mxu2 %v1352_v26  ;;  %808 = vmatpush.msra.mxu0 %v1290_v13 }
  0x6c   :  { %712 = vmatpush.msrb.mxu1 %v1284_v11  ;;  %646 = vmatpush.msrb.mxu3 %v1298_v16 }
  0x6d   :  { %628 = vmatmul.f32.vlgmr.msra.gmra.mxu2 %v575_v40  ;;  %809 = vmatpush.msra.mxu0 %v1296_v15 }
  0x6e   :  { %713 = vmatpush.msrb.mxu1 %v1290_v13  ;;  %951 = vmatpush.msk.msrb.mxu2 %vm133_vm0, %v791_v41 }
  0x6f   :  { %647 = vmatpush.msrb.mxu3 %v1310_v18  ;;  %810 = vmatpush.msra.mxu0 %v1308_v17 }
  0x70   :  { %946 = vmatmul.msk.f32.vlgmr.msrb.gmra.mxu3 %vm129_vm1, %v576_v42  ;;  %714 = vmatpush.msrb.mxu1 %v1296_v15 }
  0x71   :  { %948 = vmatpush.msk.msra.mxu3 %vm133_vm0, %v696_v43  ;;  %830 = vmatpush.msrb.mxu2 %v1256_v4 }
  0x72   :  { %715 = vmatpush.msrb.mxu1 %v1308_v17  ;;  %811 = vmatpush.msra.mxu0 %v1316_v20 }
  0x73   :  { %735 = vmatpush.msra.mxu3 %v1256_v4  ;;  %831 = vmatpush.msrb.mxu2 %v1262_v6 }
  0x74   :  { %716 = vmatpush.msrb.mxu1 %v1316_v20  ;;  %812 = vmatpush.msra.mxu0 %v1322_v21  ;;  %v969_v20 = vld [vmem:[%s1550_s2] ss:$0 sm:$0xff] }
  0x75   :  { %736 = vmatpush.msra.mxu3 %v1262_v6  ;;  %832 = vmatpush.msrb.mxu2 %v1270_v8  ;;  %v968_v6 = vld [vmem:[%s1550_s2] ss:$0 sm:$0xff] }
  0x76   :  { %717 = vmatpush.msrb.mxu1 %v1322_v21  ;;  %813 = vmatpush.msra.mxu0 %v1328_v22 }
  0x77   :  { %737 = vmatpush.msra.mxu3 %v1270_v8  ;;  %833 = vmatpush.msrb.mxu2 %v1278_v10 }
  0x78   :  { %718 = vmatpush.msrb.mxu1 %v1328_v22  ;;  %814 = vmatpush.msra.mxu0 %v1334_v23 }
  0x79   :  { %738 = vmatpush.msra.mxu3 %v1278_v10  ;;  %834 = vmatpush.msrb.mxu2 %v1286_v12 }
  0x7a   :  { %719 = vmatpush.msrb.mxu1 %v1334_v23  ;;  %815 = vmatpush.msra.mxu0 %v1340_v24 }
  0x7b   :  { %739 = vmatpush.msra.mxu3 %v1286_v12  ;;  %835 = vmatpush.msrb.mxu2 %v1292_v14 }
  0x7c   :  { %720 = vmatpush.msrb.mxu1 %v1340_v24  ;;  %816 = vmatpush.msra.mxu0 %v1346_v25 }
  0x7d   :  { %740 = vmatpush.msra.mxu3 %v1292_v14  ;;  %836 = vmatpush.msrb.mxu2 %v1298_v16 }
  0x7e   :  { %721 = vmatpush.msrb.mxu1 %v1346_v25  ;;  %817 = vmatpush.msra.mxu0 %v1352_v26 }
  0x7f   :  { %741 = vmatpush.msra.mxu3 %v1298_v16  ;;  %837 = vmatpush.msrb.mxu2 %v1310_v18 }
  0x80   :  { %722 = vmatpush.msrb.mxu1 %v1352_v26  ;;  %952 = vmatmul.msk.f32.vlgmr.msrb.gmra.mxu2 %vm129_vm1, %v766_v44 }
  0x81   :  { %742 = vmatpush.msra.mxu3 %v1310_v18  ;;  %723 = vmatmul.f32.vlgmr.msrb.gmra.mxu1 %v670_v45  ;;  %v971_v45 = vld [vmem:[%s1550_s2] ss:$0 sm:$0xff] }
  0x82   :  { %949 = vmatmul.msk.f32.vlgmr.msra.gmra.mxu3 %vm129_vm1, %v671_v46  ;;  %818 = vmatmul.f32.vlgmr.msra.gmra.mxu0 %v765_v47 }
  0xb3   :  { %v154_v50 = vpop.f32.mrf.mxu0 }
  0xb4   :  { %v155_v51 = vadd.f32 %v966_v49, %v154_v50 }
  0xb7   :  { %v174_v53 = vpop.f32.mrf.mxu1 }
  0xb8   :  { %v175_v54 = vadd.f32 %v174_v53, %v155_v51 }
  0xba   :  { %v179_v56 = vadd.f32 %v178_v52, %v175_v54 }
  0xbb   :  { %v249_v57 = vpop.f32.mrf.mxu2 }
  0xbc   :  { %v932_v58 = vadd.f32 -2.0, %v179_v56  ;;  %v183_v59 = vmul.f32 1.25, %v179_v56  ;;  %v250_v60 = vadd.f32 %v967_v55, %v249_v57  ;;  %vm182_vm2 = vcmp.gt.f32.partialorder %v179_v56, 2.0 }
  0xbe   :  { %v181_v61 = vmax.f32 %v932_v58, 0.0  ;;  %v184_v62 = vsub.f32 %v179_v56, %v183_v59  ;;  %v269_v63 = vpop.f32.mrf.mxu3  ;;  %v972_v58 = vld [vmem:[%s1550_s2] ss:$0 sm:$0xff] }
  0xbf   :  { %v270_v1 = vadd.f32 %v269_v63, %v250_v60 }
  0xc0   :  { %193 = vst [vmem:[#allocation13 + $0x8] sm:$0xff] %v181_v61  ;;  %v185_v0 = vsel %vm182_vm2, %v184_v62, %v179_v56  ;;  %v973_v62 = vld [vmem:[%s1550_s2] ss:$0 sm:$0xff]  ;;  %s866_s2 = sshll.u32 %s1553_s5, 4  ;;  %s1188_s5 = smov [#allocation16]   ;;  %s867_s2 = int_to_ptr.hbm [resolvable:$true] %s866_s2 }
  0xc1   :  { %190 = vst [vmem:[#allocation12 + $0x8] sm:$0xff] %v185_v0  ;;  %v273_v2 = vmul.f32 0.9, %v185_v0  ;;  %s902_s6 = sshll.u32 %s1188_s5, 4  ;;  %s903_s6 = int_to_ptr.vmem [resolvable:$true] %s902_s6 }
  0xc3   :  { %v274_v3 = vadd.f32 %v273_v2, %v270_v1 }
  0xc5   :  { %v935_v4 = vadd.f32 -2.0, %v274_v3  ;;  %v278_v5 = vmul.f32 1.25, %v274_v3  ;;  %vm277_vm3 = vcmp.gt.f32.partialorder %v274_v3, 2.0 }
  0xc7   :  { %v276_v7 = vmax.f32 %v935_v4, 0.0  ;;  %v279_v8 = vsub.f32 %v274_v3, %v278_v5 }
  0xc9   :  { %288 = vst [vmem:[#allocation13 + $0x10] sm:$0xff] %v276_v7  ;;  %v344_v9 = vpop.f32.mrf.mxu1  ;;  %v280_v10 = vsel %vm277_vm3, %v279_v8, %v274_v3 }
  0xca   :  { %v345_v11 = vadd.f32 %v968_v6, %v344_v9  ;;  %285 = vst [vmem:[#allocation12 + $0x10] sm:$0xff] %v280_v10  ;;  %v368_v12 = vmul.f32 0.9, %v280_v10 }
  0xcb   :  { %v364_v13 = vpop.f32.mrf.mxu3 }
  0xcc   :  { %v365_v14 = vadd.f32 %v364_v13, %v345_v11 }
  0xce   :  { %v369_v15 = vadd.f32 %v368_v12, %v365_v14 }
  0xd0   :  { %v938_v16 = vadd.f32 -2.0, %v369_v15  ;;  %v373_v17 = vmul.f32 1.25, %v369_v15  ;;  %vm372_vm4 = vcmp.gt.f32.partialorder %v369_v15, 2.0 }
  0xd2   :  { %v371_v18 = vmax.f32 %v938_v16, 0.0  ;;  %v374_v19 = vsub.f32 %v369_v15, %v373_v17 }
  0xd4   :  { %383 = vst [vmem:[#allocation13 + $0x18] sm:$0xff] %v371_v18  ;;  %v375_v21 = vsel %vm372_vm4, %v374_v19, %v369_v15 }
  0xd5   :  { %380 = vst [vmem:[#allocation12 + $0x18] sm:$0xff] %v375_v21  ;;  %v459_v23 = vpop.f32.mrf.mxu2  ;;  %v463_v26 = vmul.f32 0.9, %v375_v21 }
  0xd6   :  { %v439_v22 = vpop.f32.mrf.mxu0 }
  0xd7   :  { %v440_v24 = vadd.f32 %v969_v20, %v439_v22 }
  0xd9   :  { %v460_v25 = vadd.f32 %v459_v23, %v440_v24 }
  0xdb   :  { %v464_v27 = vadd.f32 %v463_v26, %v460_v25 }
  0xdd   :  { %v941_v28 = vadd.f32 -2.0, %v464_v27  ;;  %v468_v30 = vmul.f32 1.25, %v464_v27  ;;  %vm467_vm5 = vcmp.gt.f32.partialorder %v464_v27, 2.0 }
  0xde   :  { %v554_v34 = vpop.f32.mrf.mxu1 }
  0xdf   :  { %v466_v31 = vmax.f32 %v941_v28, 0.0  ;;  %v469_v32 = vsub.f32 %v464_v27, %v468_v30 }
  0xe0   :  { %v534_v33 = vpop.f32.mrf.mxu3 }
  0xe1   :  { %478 = vst [vmem:[#allocation13 + $0x20] sm:$0xff] %v466_v31  ;;  %v535_v35 = vadd.f32 %v970_v29, %v534_v33  ;;  %v470_v36 = vsel %vm467_vm5, %v469_v32, %v464_v27 }
  0xe2   :  { %475 = vst [vmem:[#allocation12 + $0x20] sm:$0xff] %v470_v36  ;;  %v558_v37 = vmul.f32 0.9, %v470_v36 }
  0xe3   :  { %v555_v38 = vadd.f32 %v554_v34, %v535_v35 }
  0xe5   :  { %v559_v39 = vadd.f32 %v558_v37, %v555_v38 }
  0xe7   :  { %v944_v40 = vadd.f32 -2.0, %v559_v39  ;;  %v563_v41 = vmul.f32 1.25, %v559_v39  ;;  %vm562_vm6 = vcmp.gt.f32.partialorder %v559_v39, 2.0 }
  0xe9   :  { %v561_v42 = vmax.f32 %v944_v40, 0.0  ;;  %v564_v43 = vsub.f32 %v559_v39, %v563_v41 }
  0xeb   :  { %573 = vst [vmem:[#allocation13 + $0x28] sm:$0xff] %v561_v42  ;;  %v565_v44 = vsel %vm562_vm6, %v564_v43, %v559_v39 }
  0xec   :  { %570 = vst [vmem:[#allocation12 + $0x28] sm:$0xff] %v565_v44  ;;  %v653_v51 = vmul.f32 0.9, %v565_v44 }
  0xf0   :  { %v629_v46 = vpop.f32.mrf.mxu2 }
  0xf1   :  { %v630_v47 = vadd.f32 %v971_v45, %v629_v46 }
  0xf3   :  { %v649_v49 = vpop.f32.mrf.mxu3 }
  0xf4   :  { %v650_v50 = vadd.f32 %v649_v49, %v630_v47 }
  0xf6   :  { %v654_v52 = vadd.f32 %v653_v51, %v650_v50 }
  0xf8   :  { %v947_v53 = vadd.f32 -2.0, %v654_v52  ;;  %v658_v54 = vmul.f32 1.25, %v654_v52  ;;  %vm657_vm7 = vcmp.gt.f32.partialorder %v654_v52, 2.0 }
  0xfa   :  { %v656_v55 = vmax.f32 %v947_v53, 0.0  ;;  %v659_v56 = vsub.f32 %v654_v52, %v658_v54 }
  0xfc   :  { %668 = vst [vmem:[#allocation13 + $0x30] sm:$0xff] %v656_v55  ;;  %v660_v57 = vsel %vm657_vm7, %v659_v56, %v654_v52 }
  0xfd   :  { %665 = vst [vmem:[#allocation12 + $0x30] sm:$0xff] %v660_v57  ;;  %v748_v0 = vmul.f32 0.9, %v660_v57 }
  0xfe   :  { %v724_v59 = vpop.f32.mrf.mxu1 }
  0xff   :  { %v725_v60 = vadd.f32 %v972_v58, %v724_v59  ;;  %v819_v1 = vpop.f32.mrf.mxu0 }
 0x100   :  { %v820_v3 = vadd.f32 %v973_v62, %v819_v1 }
 0x103   :  { %v839_v6 = vpop.f32.mrf.mxu2 }
 0x104   :  { %v840_v9 = vadd.f32 %v839_v6, %v820_v3 }
 0x105   :  { %v744_v61 = vpop.f32.mrf.mxu3 }
 0x106   :  { %v745_v63 = vadd.f32 %v744_v61, %v725_v60 }
 0x108   :  { %v749_v2 = vadd.f32 %v748_v0, %v745_v63 }
 0x10a   :  { %v950_v4 = vadd.f32 -2.0, %v749_v2  ;;  %v753_v5 = vmul.f32 1.25, %v749_v2  ;;  %vm752_vm8 = vcmp.gt.f32.partialorder %v749_v2, 2.0 }
 0x10c   :  { %v751_v7 = vmax.f32 %v950_v4, 0.0  ;;  %v754_v8 = vsub.f32 %v749_v2, %v753_v5 }
 0x10e   :  { %763 = vst [vmem:[#allocation13 + $0x38] sm:$0xff] %v751_v7  ;;  %v755_v10 = vsel %vm752_vm8, %v754_v8, %v749_v2 }
 0x10f   :  { %760 = vst [vmem:[#allocation12 + $0x38] sm:$0xff] %v755_v10  ;;  %v843_v11 = vmul.f32 0.9, %v755_v10  ;;  %885 = dma.vmem_to_hbm [thread:$0]  %s878_s21, 1024, %s880_s23, [#allocation14], %s1179_s13, %s1179_s13, %s1180_s14  }
 0x110   :  { %872 = dma.vmem_to_hbm [thread:$0]  %s865_s25, 1024, %s867_s2, [#allocation6], %s1179_s13, %s1179_s13, %s1180_s14  }
 0x111   :  { %v844_v12 = vadd.f32 %v843_v11, %v840_v9 }
 0x113   :  { %v848_v13 = vmul.f32 1.25, %v844_v12  ;;  %v953_v14 = vadd.f32 -2.0, %v844_v12  ;;  %vm847_vm9 = vcmp.gt.f32.partialorder %v844_v12, 2.0 }
 0x115   :  { %v849_v15 = vsub.f32 %v844_v12, %v848_v13  ;;  %v846_v16 = vmax.f32 %v953_v14, 0.0 }
 0x117   :  { %v850_v17 = vsel %vm847_vm9, %v849_v15, %v844_v12  ;;  %859 = vst [vmem:[#allocation16] sm:$0xff] %v846_v16 }
 0x118   :  { %857 = vst [vmem:[#allocation15] sm:$0xff] %v850_v17  ;;  %907 = dma.vmem_to_hbm [thread:$0]  %s903_s6, 128, %s905_s28, [#allocation17]  }
 0x119   :  { %896 = dma.vmem_to_hbm [thread:$0]  %s892_s30, 128, %s894_s11, [#allocation14]  }
 0x11a   :  { %1172 = dma.done.wait [#allocation6], 1024  }
 0x11b   :  { %1173 = vsyncadd [#allocation6], 4294966272 }
 0x11c   :  { %1174 = dma.done.wait [#allocation14], 1152  }
 0x11d   :  { %1175 = vsyncadd [#allocation14], 4294966144 }
 0x11e   :  { %1176 = dma.done.wait [#allocation17], 128  }
 0x11f   :  { %1177 = vsyncadd [#allocation17], 4294967168 }
 0x120   :  { %924 = vsyncpa [#allocation5], 1 }
 0x121   :  { %925 = vsyncpa [#allocation8], 1 }
 0x122   :  { %926 = vsyncpa [#allocation11], 1 }
 0x123   :  { %927 = vsyncpa [#allocation6], 1 }
 0x124   :  { %928 = vsyncpa [#allocation14], 1 }
 0x125   :  { %929 = vsyncpa [#allocation17], 1 }

</bundles_post_ra>
